<compile_context>
chip_gen: v5e
topology: v5e:2x2
jax: 0.10.0
libtpu: 0.0.40
codegen_flags: <defaults>
</compile_context>

<pallas_src>
import functools

import jax
import jax.numpy as jnp
from jax import lax
from jax.experimental import pallas as pl
from jax.experimental.pallas import tpu as pltpu

# ---------------- ECGSpeaker hyper-parameters (from __init__ kwargs) ----------------
VOCABULARY = 13
VOCAB_SIZE = VOCABULARY + 3          # nn.Embedding(vocabulary + 3, embedding_size)
EMB_SIZE = 32                        # embedding_size
HIDDEN = 64                          # d_model
TAU = 1.0                            # temperature
DROPOUT_P = 0.0                      # dropout kwarg -> identity (deterministic)
PAD, SOS, EOS, UNK = 0, 1, 2, 3

# synthetic "image_encoder": 2 x [conv3x3(pad=1) + ReLU + maxpool2], flatten (NCHW order)
C_IN, IMG_HW = 3, 16
C1, C2 = 8, 8
FEAT_SIZE = C2 * (IMG_HW // 4) * (IMG_HW // 4)   # final_feat_dim = 8*4*4 = 128
EMB_FEAT = 2 * FEAT_SIZE                         # self.emb_size = 2 * feat_size


def _full_spec(shape):
    """BlockSpec covering the full array (single block)."""
    zeros = (0,) * len(shape)
    return pl.BlockSpec(shape, lambda i, _z=zeros: _z)


# ====================== Kernel 1: fused conv3x3 + ReLU + maxpool2 ======================

def _conv_pool_kernel(p_ref, w_ref, b_ref, o_ref):
    # p_ref: (4, Kp, tm) bf16 patches^T, one slab per 2x2 pool quadrant.
    # w_ref: (Cout, Kp) bf16,  b_ref: (Cout, 1) f32,  o_ref: (Cout, tm) f32 (lane-dense).
    w = w_ref[...]
    b = b_ref[...]
    out = None
    for q in range(4):                                   # static unroll over pool quadrants
        y = jnp.dot(w, p_ref[q], preferred_element_type=jnp.float32)
        y = jnp.maximum(y + b, 0.0)                      # fused bias + ReLU (f32 VPU)
        out = y if out is None else jnp.maximum(out, y)  # fused 2x2 maxpool
    o_ref[...] = out


def _pooled_patchesT(x, k=3, pad=1):
    # x: (N, C, H, W) -> patches^T per pool quadrant: (4, C*k*k (padded to 8), N*(H/2)*(W/2)).
    # Row index = ci*9 + di*3 + dj matches w.reshape(Cout, C*9) flattening.
    N, C, H, W = x.shape
    Hp, Wp = H // 2, W // 2
    xp = jnp.pad(x, ((0, 0), (0, 0), (pad, pad), (pad, pad)))
    quads = []
    for qi in range(2):
        for qj in range(2):
            taps = []
            for di in range(k):
                for dj in range(k):
                    r0, c0 = qi + di, qj + dj
                    sl = xp[:, :, r0:r0 + 2 * Hp - 1:2, c0:c0 + 2 * Wp - 1:2]  # (N,C,Hp,Wp)
                    taps.append(sl)
            t = jnp.stack(taps, axis=2)                               # (N, C, 9, Hp, Wp)
            t = t.transpose(1, 2, 0, 3, 4).reshape(C * k * k, N * Hp * Wp)
            quads.append(t)
    p = jnp.stack(quads, axis=0)                                      # (4, C*9, N*Hp*Wp)
    K = C * k * k
    Kp = ((K + 7) // 8) * 8                                           # 27 -> 32, 72 -> 72
    if Kp != K:
        p = jnp.pad(p, ((0, 0), (0, Kp - K), (0, 0)))
    return p, K, Kp


def conv3x3_relu_pool(x, w, b, *, tile_m=256):
    # x: (N, Cin, H, W), w: (Cout, Cin, 3, 3), b: (Cout,) -> (N, Cout, H/2, W/2)
    N, Cin, H, W = x.shape
    Cout = w.shape[0]
    Hp, Wp = H // 2, W // 2
    Mp = N * Hp * Wp

    p, K, Kp = _pooled_patchesT(x)
    w_flat = w.reshape(Cout, K)
    if Kp != K:
        w_flat = jnp.pad(w_flat, ((0, 0), (0, Kp - K)))

    tm = tile_m if (Mp % tile_m == 0) else Mp            # lane-dense tiles (multiple of 128)

    out = pl.pallas_call(
        _conv_pool_kernel,
        grid=(Mp // tm,),
        in_specs=[pl.BlockSpec((4, Kp, tm), lambda m: (0, 0, m)),
                  pl.BlockSpec((Cout, Kp), lambda m: (0, 0)),
                  pl.BlockSpec((Cout, 1), lambda m: (0, 0))],
        out_specs=pl.BlockSpec((Cout, tm), lambda m: (0, m)),
        out_shape=jax.ShapeDtypeStruct((Cout, Mp), jnp.float32),
        compiler_params=pltpu.CompilerParams(dimension_semantics=("parallel",)),
    )(p.astype(jnp.bfloat16), w_flat.astype(jnp.bfloat16),
      b.reshape(Cout, 1).astype(jnp.float32))

    # (Cout, N*Hp*Wp) -> NCHW
    return out.reshape(Cout, N, Hp, Wp).transpose(1, 0, 2, 3)


def encode_images(x, params):
    # synthetic image encoder with final_feat_dim = FEAT_SIZE
    h = conv3x3_relu_pool(x, params["conv1_w"], params["conv1_b"])
    h = conv3x3_relu_pool(h, params["conv2_w"], params["conv2_b"])
    return h.reshape(h.shape[0], -1)                     # (N, FEAT_SIZE), NCHW flatten


# =================== Kernel 2: fused form_prototypes + init_h linear ===================

def _proto_init_h_kernel(emb_ref, tgt_ref, wp_ref, wn_ref, b_ref, o_ref):
    emb = emb_ref[...]                        # (B, n_obj, F)
    tgt = tgt_ref[...]                        # (B, n_obj)
    t = tgt[:, :, None]
    pos = jnp.sum(emb * t, axis=1)            # (B, F)
    neg = jnp.sum(emb * (1.0 - t), axis=1)    # (B, F)
    n_pos = jnp.maximum(jnp.sum(tgt, axis=1, keepdims=True), 1.0)        # clamp(min=1)
    n_neg = jnp.maximum(jnp.sum(1.0 - tgt, axis=1, keepdims=True), 1.0)
    pos = pos / n_pos
    neg = neg / n_neg
    # init_h: [pos, neg] @ W + b, with W split into (F,H)+(F,H) to avoid in-kernel concat.
    h = (jnp.dot(pos, wp_ref[...], preferred_element_type=jnp.float32)
         + jnp.dot(neg, wn_ref[...], preferred_element_type=jnp.float32)
         + b_ref[...])
    o_ref[...] = h


def pallas_proto_init_h(feats_emb, targets, w_t, b):
    B, n_obj, F = feats_emb.shape
    H = w_t.shape[1]
    wp, wn = w_t[:F, :], w_t[F:, :]
    return pl.pallas_call(
        _proto_init_h_kernel,
        grid=(1,),
        in_specs=[_full_spec((B, n_obj, F)), _full_spec((B, n_obj)),
                  _full_spec((F, H)), _full_spec((F, H)), _full_spec((1, H))],
        out_specs=_full_spec((B, H)),
        out_shape=jax.ShapeDtypeStruct((B, H), jnp.float32),
    )(feats_emb.astype(jnp.float32), targets.astype(jnp.float32),
      wp.astype(jnp.float32), wn.astype(jnp.float32),
      b.reshape(1, H).astype(jnp.float32))


# ============== Kernel 3: fused decode loop (GRU + vocab + gumbel + embed) ==============

def _decode_kernel(h0_ref, emb_ref,
                   wir_ref, wiz_ref, win_ref, whr_ref, whz_ref, whn_ref,
                   br_ref, bz_ref, bin_ref, bhn_ref,
                   outw_ref, outb_ref, noise_ref,
                   lang_ref, len_ref, *, steps, tau, vocab):
    B = h0_ref.shape[0]
    iota_v = lax.broadcasted_iota(jnp.int32, (B, vocab), 1)
    sos_oh = (iota_v == SOS).astype(jnp.float32)
    eos_oh = (iota_v == EOS).astype(jnp.float32)

    lang_ref[0] = sos_oh                                   # SOS row

    emb_w = emb_ref[...]                                   # (V, E), VMEM-resident all steps
    h = h0_ref[...]                                        # (B, H)
    inputs = jnp.dot(sos_oh, emb_w, preferred_element_type=jnp.float32)   # onehot @ embedding
    done = jnp.zeros((B, 1), jnp.float32)
    length = jnp.ones((B, 1), jnp.float32)
    inv_tau = 1.0 / tau

    # TODO(synk): the reference `if all(done_sampling): break` early exit is data-dependent;
    # we always run max_len-2 steps — the post-hoc trim to max(lang_length) yields identical output.
    for step in range(steps):                              # static unroll (steps is tiny)
        # PyTorch nn.GRU cell (gates r, z, n); three clean gate GEMMs, no sub-128 lane slicing.
        r = jax.nn.sigmoid(jnp.dot(inputs, wir_ref[...], preferred_element_type=jnp.float32)
                           + jnp.dot(h, whr_ref[...], preferred_element_type=jnp.float32)
                           + br_ref[...])
        z = jax.nn.sigmoid(jnp.dot(inputs, wiz_ref[...], preferred_element_type=jnp.float32)
                           + jnp.dot(h, whz_ref[...], preferred_element_type=jnp.float32)
                           + bz_ref[...])
        n = jnp.tanh(jnp.dot(inputs, win_ref[...], preferred_element_type=jnp.float32)
                     + bin_ref[...]
                     + r * (jnp.dot(h, whn_ref[...], preferred_element_type=jnp.float32)
                            + bhn_ref[...]))
        h = (1.0 - z) * n + z * h

        # outputs2vocab + log_softmax + gumbel noise, hard (argmax) one-hot.
        logits = jnp.dot(h, outw_ref[...], preferred_element_type=jnp.float32) + outb_ref[...]
        m = jnp.max(logits, axis=-1, keepdims=True)
        lse = jnp.log(jnp.sum(jnp.exp(logits - m), axis=-1, keepdims=True)) + m
        y = (logits - lse + noise_ref[step]) * inv_tau
        vmax = jnp.max(y, axis=-1, keepdims=True)
        first = jnp.min(jnp.where(y == vmax, iota_v, vocab), axis=-1, keepdims=True)
        onehot = (iota_v == first).astype(jnp.float32)
        # TODO(synk): straight-through estimator (y_hard - y_soft.detach() + y_soft) is not
        # emitted; forward values match F.gumbel_softmax(hard=True).
        lang_ref[1 + step] = onehot

        eos_hit = jnp.sum(onehot * eos_oh, axis=-1, keepdims=True)
        length = length + (1.0 - done)
        done = jnp.maximum(done, eos_hit)

        inputs = jnp.dot(onehot, emb_w, preferred_element_type=jnp.float32)

    lang_ref[1 + steps] = eos_oh                           # EOS row
    length = length + (1.0 - done)
    len_ref[...] = length.astype(jnp.int32)


def pallas_decode(states, noise, params, max_len, tau):
    B, H = states.shape
    V, E = params["embedding"].shape
    steps = max_len - 2

    wih, whh = params["gru_wih_t"], params["gru_whh_t"]      # (E,3H), (H,3H), gate order r,z,n
    bih, bhh = params["gru_bih"], params["gru_bhh"]
    wir, wiz, win = wih[:, :H], wih[:, H:2 * H], wih[:, 2 * H:]
    whr, whz, whn = whh[:, :H], whh[:, H:2 * H], whh[:, 2 * H:]
    b_r = (bih[:H] + bhh[:H]).reshape(1, H)
    b_z = (bih[H:2 * H] + bhh[H:2 * H]).reshape(1, H)
    b_in = bih[2 * H:].reshape(1, H)
    b_hn = bhh[2 * H:].reshape(1, H)

    kern = functools.partial(_decode_kernel, steps=steps, tau=tau, vocab=V)
    in_shapes = ([(B, H), (V, E)]
                 + [(E, H)] * 3 + [(H, H)] * 3
                 + [(1, H)] * 4
                 + [(H, V), (1, V), (max(steps, 1), B, V)])

    lang, lens = pl.pallas_call(
        kern,
        grid=(1,),
        in_specs=[_full_spec(s) for s in in_shapes],
        out_specs=(_full_spec((max_len, B, V)), _full_spec((B, 1))),
        out_shape=(jax.ShapeDtypeStruct((max_len, B, V), jnp.float32),
                   jax.ShapeDtypeStruct((B, 1), jnp.int32)),
    )(states, params["embedding"],
      wir, wiz, win, whr, whz, whn,
      b_r, b_z, b_in, b_hn,
      params["out_w_t"], params["out_b"].reshape(1, V),
      noise)

    return lang.transpose(1, 0, 2), lens.reshape(B)          # (B, max_len, V), (B,)


# ================================ model forward =====================================

def embed_features(params, feats, targets):
    B, n_obj = feats.shape[0], feats.shape[1]
    x = feats.reshape(B * n_obj, *feats.shape[2:])
    emb_flat = encode_images(x, params)                      # (B*n_obj, FEAT_SIZE)
    feats_emb = emb_flat.reshape(B, n_obj, FEAT_SIZE)
    # nn.Dropout(p=0.0) -> identity; prototypes are fused with init_h in the caller's kernel.
    return feats_emb


def ecg_speaker_forward(params, feats, targets, key, max_len=4):
    assert max_len >= 3
    feats_emb = embed_features(params, feats, targets)                        # (B, n_obj, F)
    states = pallas_proto_init_h(feats_emb, targets,
                                 params["init_h_w_t"], params["init_h_b"])    # (B, H)
    B = states.shape[0]
    steps = max(max_len - 2, 1)
    noise = jax.random.gumbel(key, (steps, B, VOCAB_SIZE), jnp.float32)       # pre-sampled
    lang_tensor, lang_length = pallas_decode(states, noise, params, max_len, TAU)
    return (lang_tensor, lang_length), states


# ================================ parameter init =====================================

def init_params(key):
    ks = jax.random.split(key, 12)

    def rn(k, shape, scale=0.1):
        return scale * jax.random.normal(k, shape, jnp.float32)

    return {
        "conv1_w": rn(ks[0], (C1, C_IN, 3, 3)),
        "conv1_b": rn(ks[1], (C1,)),
        "conv2_w": rn(ks[2], (C2, C1, 3, 3)),
        "conv2_b": rn(ks[3], (C2,)),
        "embedding": rn(ks[4], (VOCAB_SIZE, EMB_SIZE), 1.0),            # nn.Embedding weight
        "gru_wih_t": rn(ks[5], (EMB_SIZE, 3 * HIDDEN)),                 # W_ih^T (gates r,z,n)
        "gru_whh_t": rn(ks[6], (HIDDEN, 3 * HIDDEN)),                   # W_hh^T
        "gru_bih": rn(ks[7], (3 * HIDDEN,)),
        "gru_bhh": rn(ks[8], (3 * HIDDEN,)),
        "out_w_t": rn(ks[9], (HIDDEN, VOCAB_SIZE)),                     # outputs2vocab W^T
        "out_b": rn(ks[10], (VOCAB_SIZE,)),
        "init_h_w_t": rn(ks[11], (2 * FEAT_SIZE, HIDDEN)),              # init_h W^T
        "init_h_b": jnp.zeros((HIDDEN,), jnp.float32),
        # bilinear (HIDDEN -> FEAT_SIZE, no bias) exists in __init__ but is unused in forward().
    }


# ==================================== main ===========================================

if __name__ == "__main__":
    key = jax.random.PRNGKey(0)
    kp, kf, kt, ks = jax.random.split(key, 4)

    params = init_params(kp)

    B, N_OBJ = 2, 4
    feats = jax.random.normal(kf, (B, N_OBJ, C_IN, IMG_HW, IMG_HW), jnp.float32)
    targets = jax.random.bernoulli(kt, 0.5, (B, N_OBJ)).astype(jnp.float32)

    fwd = jax.jit(ecg_speaker_forward, static_argnames=("max_len",))
    (lang_tensor, lang_length), states = fwd(params, feats, targets, ks, max_len=4)
    jax.block_until_ready((lang_tensor, lang_length, states))

    # host-side trim to max lang length (mirrors lang_tensor[:, :max_lang_len, :])
    max_lang_len = int(jnp.max(lang_length))
    lang_tensor = lang_tensor[:, :max_lang_len, :]

    assert states.shape == (B, HIDDEN)
    assert lang_tensor.shape == (B, max_lang_len, VOCAB_SIZE)
    assert lang_length.shape == (B,)
    assert bool(jnp.all(jnp.isfinite(states)))
    assert bool(jnp.all(jnp.abs(jnp.sum(lang_tensor, axis=-1) - 1.0) < 1e-5))  # rows are one-hot

    print("KERNEL_OK")
</pallas_src>

<mosaic_0001>
module attributes {stable_mosaic.version = 11 : i64} {
  func.func @_conv_pool_kernel(%arg0: i32, %arg1: memref<4x32x256xbf16, #tpu.memory_space<vmem>>, %arg2: memref<8x32xbf16, #tpu.memory_space<vmem>>, %arg3: memref<8x1xf32, #tpu.memory_space<vmem>>, %arg4: memref<8x256xf32, #tpu.memory_space<vmem>>) attributes {dimension_semantics = [#tpu.dimension_semantics<parallel>], iteration_bounds = array<i64: 2>, scalar_prefetch = 0 : i64, scratch_operands = 0 : i64, tpu.core_type = #tpu.core_type<tc>, window_params = [{transform_indices = @transform_0, window_bounds = array<i64: 4, 32, 256>}, {pipeline_mode = #tpu.pipeline_mode<synchronous>, transform_indices = @transform_1, window_bounds = array<i64: 8, 32>}, {pipeline_mode = #tpu.pipeline_mode<synchronous>, transform_indices = @transform_2, window_bounds = array<i64: 8, 1>}, {transform_indices = @transform_3, window_bounds = array<i64: 8, 256>}]} {
    %c0 = arith.constant 0 : index
    %c0_0 = arith.constant 0 : index
    %0 = vector.load %arg2[%c0, %c0_0] : memref<8x32xbf16, #tpu.memory_space<vmem>>, vector<8x32xbf16>
    %c0_1 = arith.constant 0 : index
    %c0_2 = arith.constant 0 : index
    %1 = vector.load %arg3[%c0_1, %c0_2] : memref<8x1xf32, #tpu.memory_space<vmem>>, vector<8x1xf32>
    %c0_3 = arith.constant 0 : index
    %c0_4 = arith.constant 0 : index
    %c0_5 = arith.constant 0 : index
    %2 = vector.load %arg1[%c0_3, %c0_4, %c0_5] : memref<4x32x256xbf16, #tpu.memory_space<vmem>>, vector<1x32x256xbf16>
    %3 = vector.shape_cast %2 : vector<1x32x256xbf16> to vector<32x256xbf16>
    %cst = arith.constant dense<0.000000e+00> : vector<8x256xf32>
    %4 = tpu.matmul %0, %3, %cst {dimension_numbers = #tpu.dot_dimension_numbers<[1], [0], [0], [1], [0, 0, 1, 1], [], []>} : vector<8x32xbf16>, vector<32x256xbf16>, vector<8x256xf32> -> vector<8x256xf32>
    %5 = vector.broadcast %1 : vector<8x1xf32> to vector<8x256xf32>
    %6 = arith.addf %4, %5 : vector<8x256xf32>
    %cst_6 = arith.constant 0.000000e+00 : f32
    %7 = vector.broadcast %cst_6 : f32 to vector<8x256xf32>
    %8 = arith.maximumf %6, %7 : vector<8x256xf32>
    %c1 = arith.constant 1 : index
    %c0_7 = arith.constant 0 : index
    %c0_8 = arith.constant 0 : index
    %9 = vector.load %arg1[%c1, %c0_7, %c0_8] : memref<4x32x256xbf16, #tpu.memory_space<vmem>>, vector<1x32x256xbf16>
    %10 = vector.shape_cast %9 : vector<1x32x256xbf16> to vector<32x256xbf16>
    %cst_9 = arith.constant dense<0.000000e+00> : vector<8x256xf32>
    %11 = tpu.matmul %0, %10, %cst_9 {dimension_numbers = #tpu.dot_dimension_numbers<[1], [0], [0], [1], [0, 0, 1, 1], [], []>} : vector<8x32xbf16>, vector<32x256xbf16>, vector<8x256xf32> -> vector<8x256xf32>
    %12 = vector.broadcast %1 : vector<8x1xf32> to vector<8x256xf32>
    %13 = arith.addf %11, %12 : vector<8x256xf32>
    %cst_10 = arith.constant 0.000000e+00 : f32
    %14 = vector.broadcast %cst_10 : f32 to vector<8x256xf32>
    %15 = arith.maximumf %13, %14 : vector<8x256xf32>
    %16 = arith.maximumf %8, %15 : vector<8x256xf32>
    %c2 = arith.constant 2 : index
    %c0_11 = arith.constant 0 : index
    %c0_12 = arith.constant 0 : index
    %17 = vector.load %arg1[%c2, %c0_11, %c0_12] : memref<4x32x256xbf16, #tpu.memory_space<vmem>>, vector<1x32x256xbf16>
    %18 = vector.shape_cast %17 : vector<1x32x256xbf16> to vector<32x256xbf16>
    %cst_13 = arith.constant dense<0.000000e+00> : vector<8x256xf32>
    %19 = tpu.matmul %0, %18, %cst_13 {dimension_numbers = #tpu.dot_dimension_numbers<[1], [0], [0], [1], [0, 0, 1, 1], [], []>} : vector<8x32xbf16>, vector<32x256xbf16>, vector<8x256xf32> -> vector<8x256xf32>
    %20 = vector.broadcast %1 : vector<8x1xf32> to vector<8x256xf32>
    %21 = arith.addf %19, %20 : vector<8x256xf32>
    %cst_14 = arith.constant 0.000000e+00 : f32
    %22 = vector.broadcast %cst_14 : f32 to vector<8x256xf32>
    %23 = arith.maximumf %21, %22 : vector<8x256xf32>
    %24 = arith.maximumf %16, %23 : vector<8x256xf32>
    %c3 = arith.constant 3 : index
    %c0_15 = arith.constant 0 : index
    %c0_16 = arith.constant 0 : index
    %25 = vector.load %arg1[%c3, %c0_15, %c0_16] : memref<4x32x256xbf16, #tpu.memory_space<vmem>>, vector<1x32x256xbf16>
    %26 = vector.shape_cast %25 : vector<1x32x256xbf16> to vector<32x256xbf16>
    %cst_17 = arith.constant dense<0.000000e+00> : vector<8x256xf32>
    %27 = tpu.matmul %0, %26, %cst_17 {dimension_numbers = #tpu.dot_dimension_numbers<[1], [0], [0], [1], [0, 0, 1, 1], [], []>} : vector<8x32xbf16>, vector<32x256xbf16>, vector<8x256xf32> -> vector<8x256xf32>
    %28 = vector.broadcast %1 : vector<8x1xf32> to vector<8x256xf32>
    %29 = arith.addf %27, %28 : vector<8x256xf32>
    %cst_18 = arith.constant 0.000000e+00 : f32
    %30 = vector.broadcast %cst_18 : f32 to vector<8x256xf32>
    %31 = arith.maximumf %29, %30 : vector<8x256xf32>
    %32 = arith.maximumf %24, %31 : vector<8x256xf32>
    %c0_19 = arith.constant 0 : index
    %c0_20 = arith.constant 0 : index
    %33 = vector.load %arg4[%c0_19, %c0_20] : memref<8x256xf32, #tpu.memory_space<vmem>>, vector<8x256xf32>
    tpu.vector_store %arg4[%c0_19, %c0_20], %32 {strides = array<i32>} : memref<8x256xf32, #tpu.memory_space<vmem>>, vector<8x256xf32>,
    return
  }
  func.func @transform_0(%arg0: i32) -> (i32, i32, i32) {
    %c0_i32 = arith.constant 0 : i32
    %c0_i32_0 = arith.constant 0 : i32
    %c0_i32_1 = arith.constant 0 : i32
    return %c0_i32, %c0_i32_0, %arg0 : i32, i32, i32
  }
  func.func @transform_1(%arg0: i32) -> (i32, i32) {
    %c0_i32 = arith.constant 0 : i32
    %c0_i32_0 = arith.constant 0 : i32
    %c0_i32_1 = arith.constant 0 : i32
    return %c0_i32, %c0_i32_0 : i32, i32
  }
  func.func @transform_2(%arg0: i32) -> (i32, i32) {
    %c0_i32 = arith.constant 0 : i32
    %c0_i32_0 = arith.constant 0 : i32
    %c0_i32_1 = arith.constant 0 : i32
    return %c0_i32, %c0_i32_0 : i32, i32
  }
  func.func @transform_3(%arg0: i32) -> (i32, i32) {
    %c0_i32 = arith.constant 0 : i32
    %c0_i32_0 = arith.constant 0 : i32
    return %c0_i32, %arg0 : i32, i32
  }
}

module attributes {stable_mosaic.version = 11 : i64} {
  func.func @_conv_pool_kernel(%arg0: i32, %arg1: memref<4x72x128xbf16, #tpu.memory_space<vmem>>, %arg2: memref<8x72xbf16, #tpu.memory_space<vmem>>, %arg3: memref<8x1xf32, #tpu.memory_space<vmem>>, %arg4: memref<8x128xf32, #tpu.memory_space<vmem>>) attributes {dimension_semantics = [#tpu.dimension_semantics<parallel>], iteration_bounds = array<i64: 1>, scalar_prefetch = 0 : i64, scratch_operands = 0 : i64, tpu.core_type = #tpu.core_type<tc>, window_params = [{transform_indices = @transform_0, window_bounds = array<i64: 4, 72, 128>}, {pipeline_mode = #tpu.pipeline_mode<synchronous>, transform_indices = @transform_1, window_bounds = array<i64: 8, 72>}, {pipeline_mode = #tpu.pipeline_mode<synchronous>, transform_indices = @transform_2, window_bounds = array<i64: 8, 1>}, {transform_indices = @transform_3, window_bounds = array<i64: 8, 128>}]} {
    %c0 = arith.constant 0 : index
    %c0_0 = arith.constant 0 : index
    %0 = vector.load %arg2[%c0, %c0_0] : memref<8x72xbf16, #tpu.memory_space<vmem>>, vector<8x72xbf16>
    %c0_1 = arith.constant 0 : index
    %c0_2 = arith.constant 0 : index
    %1 = vector.load %arg3[%c0_1, %c0_2] : memref<8x1xf32, #tpu.memory_space<vmem>>, vector<8x1xf32>
    %c0_3 = arith.constant 0 : index
    %c0_4 = arith.constant 0 : index
    %c0_5 = arith.constant 0 : index
    %2 = vector.load %arg1[%c0_3, %c0_4, %c0_5] : memref<4x72x128xbf16, #tpu.memory_space<vmem>>, vector<1x72x128xbf16>
    %3 = vector.shape_cast %2 : vector<1x72x128xbf16> to vector<72x128xbf16>
    %cst = arith.constant dense<0.000000e+00> : vector<8x128xf32>
    %4 = tpu.matmul %0, %3, %cst {dimension_numbers = #tpu.dot_dimension_numbers<[1], [0], [0], [1], [0, 0, 1, 1], [], []>} : vector<8x72xbf16>, vector<72x128xbf16>, vector<8x128xf32> -> vector<8x128xf32>
    %5 = vector.broadcast %1 : vector<8x1xf32> to vector<8x128xf32>
    %6 = arith.addf %4, %5 : vector<8x128xf32>
    %cst_6 = arith.constant 0.000000e+00 : f32
    %7 = vector.broadcast %cst_6 : f32 to vector<8x128xf32>
    %8 = arith.maximumf %6, %7 : vector<8x128xf32>
    %c1 = arith.constant 1 : index
    %c0_7 = arith.constant 0 : index
    %c0_8 = arith.constant 0 : index
    %9 = vector.load %arg1[%c1, %c0_7, %c0_8] : memref<4x72x128xbf16, #tpu.memory_space<vmem>>, vector<1x72x128xbf16>
    %10 = vector.shape_cast %9 : vector<1x72x128xbf16> to vector<72x128xbf16>
    %cst_9 = arith.constant dense<0.000000e+00> : vector<8x128xf32>
    %11 = tpu.matmul %0, %10, %cst_9 {dimension_numbers = #tpu.dot_dimension_numbers<[1], [0], [0], [1], [0, 0, 1, 1], [], []>} : vector<8x72xbf16>, vector<72x128xbf16>, vector<8x128xf32> -> vector<8x128xf32>
    %12 = vector.broadcast %1 : vector<8x1xf32> to vector<8x128xf32>
    %13 = arith.addf %11, %12 : vector<8x128xf32>
    %cst_10 = arith.constant 0.000000e+00 : f32
    %14 = vector.broadcast %cst_10 : f32 to vector<8x128xf32>
    %15 = arith.maximumf %13, %14 : vector<8x128xf32>
    %16 = arith.maximumf %8, %15 : vector<8x128xf32>
    %c2 = arith.constant 2 : index
    %c0_11 = arith.constant 0 : index
    %c0_12 = arith.constant 0 : index
    %17 = vector.load %arg1[%c2, %c0_11, %c0_12] : memref<4x72x128xbf16, #tpu.memory_space<vmem>>, vector<1x72x128xbf16>
    %18 = vector.shape_cast %17 : vector<1x72x128xbf16> to vector<72x128xbf16>
    %cst_13 = arith.constant dense<0.000000e+00> : vector<8x128xf32>
    %19 = tpu.matmul %0, %18, %cst_13 {dimension_numbers = #tpu.dot_dimension_numbers<[1], [0], [0], [1], [0, 0, 1, 1], [], []>} : vector<8x72xbf16>, vector<72x128xbf16>, vector<8x128xf32> -> vector<8x128xf32>
    %20 = vector.broadcast %1 : vector<8x1xf32> to vector<8x128xf32>
    %21 = arith.addf %19, %20 : vector<8x128xf32>
    %cst_14 = arith.constant 0.000000e+00 : f32
    %22 = vector.broadcast %cst_14 : f32 to vector<8x128xf32>
    %23 = arith.maximumf %21, %22 : vector<8x128xf32>
    %24 = arith.maximumf %16, %23 : vector<8x128xf32>
    %c3 = arith.constant 3 : index
    %c0_15 = arith.constant 0 : index
    %c0_16 = arith.constant 0 : index
    %25 = vector.load %arg1[%c3, %c0_15, %c0_16] : memref<4x72x128xbf16, #tpu.memory_space<vmem>>, vector<1x72x128xbf16>
    %26 = vector.shape_cast %25 : vector<1x72x128xbf16> to vector<72x128xbf16>
    %cst_17 = arith.constant dense<0.000000e+00> : vector<8x128xf32>
    %27 = tpu.matmul %0, %26, %cst_17 {dimension_numbers = #tpu.dot_dimension_numbers<[1], [0], [0], [1], [0, 0, 1, 1], [], []>} : vector<8x72xbf16>, vector<72x128xbf16>, vector<8x128xf32> -> vector<8x128xf32>
    %28 = vector.broadcast %1 : vector<8x1xf32> to vector<8x128xf32>
    %29 = arith.addf %27, %28 : vector<8x128xf32>
    %cst_18 = arith.constant 0.000000e+00 : f32
    %30 = vector.broadcast %cst_18 : f32 to vector<8x128xf32>
    %31 = arith.maximumf %29, %30 : vector<8x128xf32>
    %32 = arith.maximumf %24, %31 : vector<8x128xf32>
    %c0_19 = arith.constant 0 : index
    %c0_20 = arith.constant 0 : index
    %33 = vector.load %arg4[%c0_19, %c0_20] : memref<8x128xf32, #tpu.memory_space<vmem>>, vector<8x128xf32>
    tpu.vector_store %arg4[%c0_19, %c0_20], %32 {strides = array<i32>} : memref<8x128xf32, #tpu.memory_space<vmem>>, vector<8x128xf32>,
    return
  }
  func.func @transform_0(%arg0: i32) -> (i32, i32, i32) {
    %c0_i32 = arith.constant 0 : i32
    %c0_i32_0 = arith.constant 0 : i32
    %c0_i32_1 = arith.constant 0 : i32
    return %c0_i32, %c0_i32_0, %arg0 : i32, i32, i32
  }
  func.func @transform_1(%arg0: i32) -> (i32, i32) {
    %c0_i32 = arith.constant 0 : i32
    %c0_i32_0 = arith.constant 0 : i32
    %c0_i32_1 = arith.constant 0 : i32
    return %c0_i32, %c0_i32_0 : i32, i32
  }
  func.func @transform_2(%arg0: i32) -> (i32, i32) {
    %c0_i32 = arith.constant 0 : i32
    %c0_i32_0 = arith.constant 0 : i32
    %c0_i32_1 = arith.constant 0 : i32
    return %c0_i32, %c0_i32_0 : i32, i32
  }
  func.func @transform_3(%arg0: i32) -> (i32, i32) {
    %c0_i32 = arith.constant 0 : i32
    %c0_i32_0 = arith.constant 0 : i32
    return %c0_i32, %arg0 : i32, i32
  }
}

module attributes {stable_mosaic.version = 11 : i64} {
  func.func @_proto_init_h_kernel(%arg0: i32, %arg1: memref<2x4x128xf32, #tpu.memory_space<vmem>>, %arg2: memref<2x4xf32, #tpu.memory_space<vmem>>, %arg3: memref<128x64xf32, #tpu.memory_space<vmem>>, %arg4: memref<128x64xf32, #tpu.memory_space<vmem>>, %arg5: memref<1x64xf32, #tpu.memory_space<vmem>>, %arg6: memref<2x64xf32, #tpu.memory_space<vmem>>) attributes {dimension_semantics = [#tpu.dimension_semantics<arbitrary>], iteration_bounds = array<i64: 1>, scalar_prefetch = 0 : i64, scratch_operands = 0 : i64, tpu.core_type = #tpu.core_type<tc>, window_params = [{pipeline_mode = #tpu.pipeline_mode<synchronous>, transform_indices = @transform_0, window_bounds = array<i64: 2, 4, 128>}, {pipeline_mode = #tpu.pipeline_mode<synchronous>, transform_indices = @transform_1, window_bounds = array<i64: 2, 4>}, {pipeline_mode = #tpu.pipeline_mode<synchronous>, transform_indices = @transform_2, window_bounds = array<i64: 128, 64>}, {pipeline_mode = #tpu.pipeline_mode<synchronous>, transform_indices = @transform_3, window_bounds = array<i64: 128, 64>}, {pipeline_mode = #tpu.pipeline_mode<synchronous>, transform_indices = @transform_4, window_bounds = array<i64: 1, 64>}, {pipeline_mode = #tpu.pipeline_mode<synchronous>, transform_indices = @transform_5, window_bounds = array<i64: 2, 64>}]} {
    %c0 = arith.constant 0 : index
    %c0_0 = arith.constant 0 : index
    %c0_1 = arith.constant 0 : index
    %0 = vector.load %arg1[%c0, %c0_0, %c0_1] : memref<2x4x128xf32, #tpu.memory_space<vmem>>, vector<2x4x128xf32>
    %c0_2 = arith.constant 0 : index
    %c0_3 = arith.constant 0 : index
    %1 = vector.load %arg2[%c0_2, %c0_3] : memref<2x4xf32, #tpu.memory_space<vmem>>, vector<2x4xf32>
    %2 = vector.shape_cast %1 : vector<2x4xf32> to vector<2x4x1xf32>
    %3 = vector.broadcast %2 : vector<2x4x1xf32> to vector<2x4x128xf32>
    %4 = arith.mulf %0, %3 : vector<2x4x128xf32>
    %cst = arith.constant dense<0.000000e+00> : vector<2x128xf32>
    %5 = vector.multi_reduction <add>, %4, %cst [1] : vector<2x4x128xf32> to vector<2x128xf32>
    %cst_4 = arith.constant 1.000000e+00 : f32
    %6 = vector.broadcast %cst_4 : f32 to vector<2x4x1xf32>
    %7 = arith.subf %6, %2 : vector<2x4x1xf32>
    %8 = vector.broadcast %7 : vector<2x4x1xf32> to vector<2x4x128xf32>
    %9 = arith.mulf %0, %8 : vector<2x4x128xf32>
    %cst_5 = arith.constant dense<0.000000e+00> : vector<2x128xf32>
    %10 = vector.multi_reduction <add>, %9, %cst_5 [1] : vector<2x4x128xf32> to vector<2x128xf32>
    %cst_6 = arith.constant dense<0.000000e+00> : vector<2xf32>
    %11 = vector.multi_reduction <add>, %1, %cst_6 [1] : vector<2x4xf32> to vector<2xf32>
    %12 = vector.shape_cast %11 : vector<2xf32> to vector<2x1xf32>
    %cst_7 = arith.constant 1.000000e+00 : f32
    %13 = vector.broadcast %cst_7 : f32 to vector<2x1xf32>
    %14 = arith.maximumf %12, %13 : vector<2x1xf32>
    %cst_8 = arith.constant 1.000000e+00 : f32
    %15 = vector.broadcast %cst_8 : f32 to vector<2x4xf32>
    %16 = arith.subf %15, %1 : vector<2x4xf32>
    %cst_9 = arith.constant dense<0.000000e+00> : vector<2xf32>
    %17 = vector.multi_reduction <add>, %16, %cst_9 [1] : vector<2x4xf32> to vector<2xf32>
    %18 = vector.shape_cast %17 : vector<2xf32> to vector<2x1xf32>
    %cst_10 = arith.constant 1.000000e+00 : f32
    %19 = vector.broadcast %cst_10 : f32 to vector<2x1xf32>
    %20 = arith.maximumf %18, %19 : vector<2x1xf32>
    %21 = vector.broadcast %14 : vector<2x1xf32> to vector<2x128xf32>
    %22 = arith.divf %5, %21 : vector<2x128xf32>
    %23 = vector.broadcast %20 : vector<2x1xf32> to vector<2x128xf32>
    %24 = arith.divf %10, %23 : vector<2x128xf32>
    %c0_11 = arith.constant 0 : index
    %c0_12 = arith.constant 0 : index
    %25 = vector.load %arg3[%c0_11, %c0_12] : memref<128x64xf32, #tpu.memory_space<vmem>>, vector<128x64xf32>
    %cst_13 = arith.constant dense<0.000000e+00> : vector<2x64xf32>
    %26 = tpu.matmul %22, %25, %cst_13 {dimension_numbers = #tpu.dot_dimension_numbers<[1], [0], [0], [1], [0, 0, 1, 1], [], []>} : vector<2x128xf32>, vector<128x64xf32>, vector<2x64xf32> -> vector<2x64xf32>
    %c0_14 = arith.constant 0 : index
    %c0_15 = arith.constant 0 : index
    %27 = vector.load %arg4[%c0_14, %c0_15] : memref<128x64xf32, #tpu.memory_space<vmem>>, vector<128x64xf32>
    %cst_16 = arith.constant dense<0.000000e+00> : vector<2x64xf32>
    %28 = tpu.matmul %24, %27, %cst_16 {dimension_numbers = #tpu.dot_dimension_numbers<[1], [0], [0], [1], [0, 0, 1, 1], [], []>} : vector<2x128xf32>, vector<128x64xf32>, vector<2x64xf32> -> vector<2x64xf32>
    %29 = arith.addf %26, %28 : vector<2x64xf32>
    %c0_17 = arith.constant 0 : index
    %c0_18 = arith.constant 0 : index
    %30 = vector.load %arg5[%c0_17, %c0_18] : memref<1x64xf32, #tpu.memory_space<vmem>>, vector<1x64xf32>
    %31 = vector.broadcast %30 : vector<1x64xf32> to vector<2x64xf32>
    %32 = arith.addf %29, %31 : vector<2x64xf32>
    %c0_19 = arith.constant 0 : index
    %c0_20 = arith.constant 0 : index
    %33 = vector.load %arg6[%c0_19, %c0_20] : memref<2x64xf32, #tpu.memory_space<vmem>>, vector<2x64xf32>
    tpu.vector_store %arg6[%c0_19, %c0_20], %32 {strides = array<i32>} : memref<2x64xf32, #tpu.memory_space<vmem>>, vector<2x64xf32>,
    return
  }
  func.func @transform_0(%arg0: i32) -> (i32, i32, i32) {
    %c0_i32 = arith.constant 0 : i32
    %c0_i32_0 = arith.constant 0 : i32
    %c0_i32_1 = arith.constant 0 : i32
    %c0_i32_2 = arith.constant 0 : i32
    return %c0_i32, %c0_i32_0, %c0_i32_1 : i32, i32, i32
  }
  func.func @transform_1(%arg0: i32) -> (i32, i32) {
    %c0_i32 = arith.constant 0 : i32
    %c0_i32_0 = arith.constant 0 : i32
    %c0_i32_1 = arith.constant 0 : i32
    return %c0_i32, %c0_i32_0 : i32, i32
  }
  func.func @transform_2(%arg0: i32) -> (i32, i32) {
    %c0_i32 = arith.constant 0 : i32
    %c0_i32_0 = arith.constant 0 : i32
    %c0_i32_1 = arith.constant 0 : i32
    return %c0_i32, %c0_i32_0 : i32, i32
  }
  func.func @transform_3(%arg0: i32) -> (i32, i32) {
    %c0_i32 = arith.constant 0 : i32
    %c0_i32_0 = arith.constant 0 : i32
    %c0_i32_1 = arith.constant 0 : i32
    return %c0_i32, %c0_i32_0 : i32, i32
  }
  func.func @transform_4(%arg0: i32) -> (i32, i32) {
    %c0_i32 = arith.constant 0 : i32
    %c0_i32_0 = arith.constant 0 : i32
    %c0_i32_1 = arith.constant 0 : i32
    return %c0_i32, %c0_i32_0 : i32, i32
  }
  func.func @transform_5(%arg0: i32) -> (i32, i32) {
    %c0_i32 = arith.constant 0 : i32
    %c0_i32_0 = arith.constant 0 : i32
    %c0_i32_1 = arith.constant 0 : i32
    return %c0_i32, %c0_i32_0 : i32, i32
  }
}

module attributes {stable_mosaic.version = 11 : i64} {
  func.func @_decode_kernel(%arg0: i32, %arg1: memref<2x64xf32, #tpu.memory_space<vmem>>, %arg2: memref<16x32xf32, #tpu.memory_space<vmem>>, %arg3: memref<32x64xf32, #tpu.memory_space<vmem>>, %arg4: memref<32x64xf32, #tpu.memory_space<vmem>>, %arg5: memref<32x64xf32, #tpu.memory_space<vmem>>, %arg6: memref<64x64xf32, #tpu.memory_space<vmem>>, %arg7: memref<64x64xf32, #tpu.memory_space<vmem>>, %arg8: memref<64x64xf32, #tpu.memory_space<vmem>>, %arg9: memref<1x64xf32, #tpu.memory_space<vmem>>, %arg10: memref<1x64xf32, #tpu.memory_space<vmem>>, %arg11: memref<1x64xf32, #tpu.memory_space<vmem>>, %arg12: memref<1x64xf32, #tpu.memory_space<vmem>>, %arg13: memref<64x16xf32, #tpu.memory_space<vmem>>, %arg14: memref<1x16xf32, #tpu.memory_space<vmem>>, %arg15: memref<2x2x16xf32, #tpu.memory_space<vmem>>, %arg16: memref<4x2x16xf32, #tpu.memory_space<vmem>>, %arg17: memref<2x1xi32, #tpu.memory_space<vmem>>) attributes {dimension_semantics = [#tpu.dimension_semantics<arbitrary>], iteration_bounds = array<i64: 1>, scalar_prefetch = 0 : i64, scratch_operands = 0 : i64, tpu.core_type = #tpu.core_type<tc>, window_params = [{pipeline_mode = #tpu.pipeline_mode<synchronous>, transform_indices = @transform_0, window_bounds = array<i64: 2, 64>}, {pipeline_mode = #tpu.pipeline_mode<synchronous>, transform_indices = @transform_1, window_bounds = array<i64: 16, 32>}, {pipeline_mode = #tpu.pipeline_mode<synchronous>, transform_indices = @transform_2, window_bounds = array<i64: 32, 64>}, {pipeline_mode = #tpu.pipeline_mode<synchronous>, transform_indices = @transform_3, window_bounds = array<i64: 32, 64>}, {pipeline_mode = #tpu.pipeline_mode<synchronous>, transform_indices = @transform_4, window_bounds = array<i64: 32, 64>}, {pipeline_mode = #tpu.pipeline_mode<synchronous>, transform_indices = @transform_5, window_bounds = array<i64: 64, 64>}, {pipeline_mode = #tpu.pipeline_mode<synchronous>, transform_indices = @transform_6, window_bounds = array<i64: 64, 64>}, {pipeline_mode = #tpu.pipeline_mode<synchronous>, transform_indices = @transform_7, window_bounds = array<i64: 64, 64>}, {pipeline_mode = #tpu.pipeline_mode<synchronous>, transform_indices = @transform_8, window_bounds = array<i64: 1, 64>}, {pipeline_mode = #tpu.pipeline_mode<synchronous>, transform_indices = @transform_9, window_bounds = array<i64: 1, 64>}, {pipeline_mode = #tpu.pipeline_mode<synchronous>, transform_indices = @transform_10, window_bounds = array<i64: 1, 64>}, {pipeline_mode = #tpu.pipeline_mode<synchronous>, transform_indices = @transform_11, window_bounds = array<i64: 1, 64>}, {pipeline_mode = #tpu.pipeline_mode<synchronous>, transform_indices = @transform_12, window_bounds = array<i64: 64, 16>}, {pipeline_mode = #tpu.pipeline_mode<synchronous>, transform_indices = @transform_13, window_bounds = array<i64: 1, 16>}, {pipeline_mode = #tpu.pipeline_mode<synchronous>, transform_indices = @transform_14, window_bounds = array<i64: 2, 2, 16>}, {pipeline_mode = #tpu.pipeline_mode<synchronous>, transform_indices = @transform_15, window_bounds = array<i64: 4, 2, 16>}, {pipeline_mode = #tpu.pipeline_mode<synchronous>, transform_indices = @transform_16, window_bounds = array<i64: 2, 1>}]} {
    %0 = tpu.iota {dimensions = array<i32: 1>} : vector<2x16xi32>
    %c1_i32 = arith.constant 1 : i32
    %1 = vector.broadcast %c1_i32 : i32 to vector<2x16xi32>
    %2 = arith.cmpi eq, %0, %1 : vector<2x16xi32>
    %3 = arith.extui %2 : vector<2x16xi1> to vector<2x16xi32>
    %4 = arith.sitofp %3 : vector<2x16xi32> to vector<2x16xf32>
    %c2_i32 = arith.constant 2 : i32
    %5 = vector.broadcast %c2_i32 : i32 to vector<2x16xi32>
    %6 = arith.cmpi eq, %0, %5 : vector<2x16xi32>
    %7 = arith.extui %6 : vector<2x16xi1> to vector<2x16xi32>
    %8 = arith.sitofp %7 : vector<2x16xi32> to vector<2x16xf32>
    %c0 = arith.constant 0 : index
    %c0_0 = arith.constant 0 : index
    %c0_1 = arith.constant 0 : index
    %9 = vector.load %arg16[%c0, %c0_0, %c0_1] : memref<4x2x16xf32, #tpu.memory_space<vmem>>, vector<1x2x16xf32>
    %10 = vector.shape_cast %9 : vector<1x2x16xf32> to vector<2x16xf32>
    %11 = vector.shape_cast %4 : vector<2x16xf32> to vector<1x2x16xf32>
    tpu.vector_store %arg16[%c0, %c0_0, %c0_1], %11 {strides = array<i32>} : memref<4x2x16xf32, #tpu.memory_space<vmem>>, vector<1x2x16xf32>,
    %c0_2 = arith.constant 0 : index
    %c0_3 = arith.constant 0 : index
    %12 = vector.load %arg2[%c0_2, %c0_3] : memref<16x32xf32, #tpu.memory_space<vmem>>, vector<16x32xf32>
    %c0_4 = arith.constant 0 : index
    %c0_5 = arith.constant 0 : index
    %13 = vector.load %arg1[%c0_4, %c0_5] : memref<2x64xf32, #tpu.memory_space<vmem>>, vector<2x64xf32>
    %cst = arith.constant dense<0.000000e+00> : vector<2x32xf32>
    %14 = tpu.matmul %4, %12, %cst {dimension_numbers = #tpu.dot_dimension_numbers<[1], [0], [0], [1], [0, 0, 1, 1], [], []>} : vector<2x16xf32>, vector<16x32xf32>, vector<2x32xf32> -> vector<2x32xf32>
    %cst_6 = arith.constant 0.000000e+00 : f32
    %15 = vector.broadcast %cst_6 : f32 to vector<2x1xf32>
    %cst_7 = arith.constant 1.000000e+00 : f32
    %16 = vector.broadcast %cst_7 : f32 to vector<2x1xf32>
    %c0_8 = arith.constant 0 : index
    %c0_9 = arith.constant 0 : index
    %17 = vector.load %arg3[%c0_8, %c0_9] : memref<32x64xf32, #tpu.memory_space<vmem>>, vector<32x64xf32>
    %cst_10 = arith.constant dense<0.000000e+00> : vector<2x64xf32>
    %18 = tpu.matmul %14, %17, %cst_10 {dimension_numbers = #tpu.dot_dimension_numbers<[1], [0], [0], [1], [0, 0, 1, 1], [], []>} : vector<2x32xf32>, vector<32x64xf32>, vector<2x64xf32> -> vector<2x64xf32>
    %c0_11 = arith.constant 0 : index
    %c0_12 = arith.constant 0 : index
    %19 = vector.load %arg6[%c0_11, %c0_12] : memref<64x64xf32, #tpu.memory_space<vmem>>, vector<64x64xf32>
    %cst_13 = arith.constant dense<0.000000e+00> : vector<2x64xf32>
    %20 = tpu.matmul %13, %19, %cst_13 {dimension_numbers = #tpu.dot_dimension_numbers<[1], [0], [0], [1], [0, 0, 1, 1], [], []>} : vector<2x64xf32>, vector<64x64xf32>, vector<2x64xf32> -> vector<2x64xf32>
    %21 = arith.addf %18, %20 : vector<2x64xf32>
    %c0_14 = arith.constant 0 : index
    %c0_15 = arith.constant 0 : index
    %22 = vector.load %arg9[%c0_14, %c0_15] : memref<1x64xf32, #tpu.memory_space<vmem>>, vector<1x64xf32>
    %23 = vector.broadcast %22 : vector<1x64xf32> to vector<2x64xf32>
    %24 = arith.addf %21, %23 : vector<2x64xf32>
    %25 = arith.negf %24 : vector<2x64xf32>
    %26 = math.exp %25 : vector<2x64xf32>
    %cst_16 = arith.constant 1.000000e+00 : f32
    %27 = vector.broadcast %cst_16 : f32 to vector<2x64xf32>
    %28 = arith.addf %27, %26 : vector<2x64xf32>
    %29 = arith.divf %27, %28 : vector<2x64xf32>
    %c0_17 = arith.constant 0 : index
    %c0_18 = arith.constant 0 : index
    %30 = vector.load %arg4[%c0_17, %c0_18] : memref<32x64xf32, #tpu.memory_space<vmem>>, vector<32x64xf32>
    %cst_19 = arith.constant dense<0.000000e+00> : vector<2x64xf32>
    %31 = tpu.matmul %14, %30, %cst_19 {dimension_numbers = #tpu.dot_dimension_numbers<[1], [0], [0], [1], [0, 0, 1, 1], [], []>} : vector<2x32xf32>, vector<32x64xf32>, vector<2x64xf32> -> vector<2x64xf32>
    %c0_20 = arith.constant 0 : index
    %c0_21 = arith.constant 0 : index
    %32 = vector.load %arg7[%c0_20, %c0_21] : memref<64x64xf32, #tpu.memory_space<vmem>>, vector<64x64xf32>
    %cst_22 = arith.constant dense<0.000000e+00> : vector<2x64xf32>
    %33 = tpu.matmul %13, %32, %cst_22 {dimension_numbers = #tpu.dot_dimension_numbers<[1], [0], [0], [1], [0, 0, 1, 1], [], []>} : vector<2x64xf32>, vector<64x64xf32>, vector<2x64xf32> -> vector<2x64xf32>
    %34 = arith.addf %31, %33 : vector<2x64xf32>
    %c0_23 = arith.constant 0 : index
    %c0_24 = arith.constant 0 : index
    %35 = vector.load %arg10[%c0_23, %c0_24] : memref<1x64xf32, #tpu.memory_space<vmem>>, vector<1x64xf32>
    %36 = vector.broadcast %35 : vector<1x64xf32> to vector<2x64xf32>
    %37 = arith.addf %34, %36 : vector<2x64xf32>
    %38 = arith.negf %37 : vector<2x64xf32>
    %39 = math.exp %38 : vector<2x64xf32>
    %cst_25 = arith.constant 1.000000e+00 : f32
    %40 = vector.broadcast %cst_25 : f32 to vector<2x64xf32>
    %41 = arith.addf %40, %39 : vector<2x64xf32>
    %42 = arith.divf %40, %41 : vector<2x64xf32>
    %c0_26 = arith.constant 0 : index
    %c0_27 = arith.constant 0 : index
    %43 = vector.load %arg5[%c0_26, %c0_27] : memref<32x64xf32, #tpu.memory_space<vmem>>, vector<32x64xf32>
    %cst_28 = arith.constant dense<0.000000e+00> : vector<2x64xf32>
    %44 = tpu.matmul %14, %43, %cst_28 {dimension_numbers = #tpu.dot_dimension_numbers<[1], [0], [0], [1], [0, 0, 1, 1], [], []>} : vector<2x32xf32>, vector<32x64xf32>, vector<2x64xf32> -> vector<2x64xf32>
    %c0_29 = arith.constant 0 : index
    %c0_30 = arith.constant 0 : index
    %45 = vector.load %arg11[%c0_29, %c0_30] : memref<1x64xf32, #tpu.memory_space<vmem>>, vector<1x64xf32>
    %46 = vector.broadcast %45 : vector<1x64xf32> to vector<2x64xf32>
    %47 = arith.addf %44, %46 : vector<2x64xf32>
    %c0_31 = arith.constant 0 : index
    %c0_32 = arith.constant 0 : index
    %48 = vector.load %arg8[%c0_31, %c0_32] : memref<64x64xf32, #tpu.memory_space<vmem>>, vector<64x64xf32>
    %cst_33 = arith.constant dense<0.000000e+00> : vector<2x64xf32>
    %49 = tpu.matmul %13, %48, %cst_33 {dimension_numbers = #tpu.dot_dimension_numbers<[1], [0], [0], [1], [0, 0, 1, 1], [], []>} : vector<2x64xf32>, vector<64x64xf32>, vector<2x64xf32> -> vector<2x64xf32>
    %c0_34 = arith.constant 0 : index
    %c0_35 = arith.constant 0 : index
    %50 = vector.load %arg12[%c0_34, %c0_35] : memref<1x64xf32, #tpu.memory_space<vmem>>, vector<1x64xf32>
    %51 = vector.broadcast %50 : vector<1x64xf32> to vector<2x64xf32>
    %52 = arith.addf %49, %51 : vector<2x64xf32>
    %53 = arith.mulf %29, %52 : vector<2x64xf32>
    %54 = arith.addf %47, %53 : vector<2x64xf32>
    %55 = math.tanh %54 : vector<2x64xf32>
    %cst_36 = arith.constant 1.000000e+00 : f32
    %56 = vector.broadcast %cst_36 : f32 to vector<2x64xf32>
    %57 = arith.subf %56, %42 : vector<2x64xf32>
    %58 = arith.mulf %57, %55 : vector<2x64xf32>
    %59 = arith.mulf %42, %13 : vector<2x64xf32>
    %60 = arith.addf %58, %59 : vector<2x64xf32>
    %c0_37 = arith.constant 0 : index
    %c0_38 = arith.constant 0 : index
    %61 = vector.load %arg13[%c0_37, %c0_38] : memref<64x16xf32, #tpu.memory_space<vmem>>, vector<64x16xf32>
    %cst_39 = arith.constant dense<0.000000e+00> : vector<2x16xf32>
    %62 = tpu.matmul %60, %61, %cst_39 {dimension_numbers = #tpu.dot_dimension_numbers<[1], [0], [0], [1], [0, 0, 1, 1], [], []>} : vector<2x64xf32>, vector<64x16xf32>, vector<2x16xf32> -> vector<2x16xf32>
    %c0_40 = arith.constant 0 : index
    %c0_41 = arith.constant 0 : index
    %63 = vector.load %arg14[%c0_40, %c0_41] : memref<1x16xf32, #tpu.memory_space<vmem>>, vector<1x16xf32>
    %64 = vector.broadcast %63 : vector<1x16xf32> to vector<2x16xf32>
    %65 = arith.addf %62, %64 : vector<2x16xf32>
    %cst_42 = arith.constant dense<0xFF800000> : vector<2xf32>
    %66 = vector.multi_reduction <maximumf>, %65, %cst_42 [1] : vector<2x16xf32> to vector<2xf32>
    %67 = vector.shape_cast %66 : vector<2xf32> to vector<2x1xf32>
    %68 = vector.broadcast %67 : vector<2x1xf32> to vector<2x16xf32>
    %69 = arith.subf %65, %68 : vector<2x16xf32>
    %70 = math.exp %69 : vector<2x16xf32>
    %cst_43 = arith.constant dense<0.000000e+00> : vector<2xf32>
    %71 = vector.multi_reduction <add>, %70, %cst_43 [1] : vector<2x16xf32> to vector<2xf32>
    %72 = vector.shape_cast %71 : vector<2xf32> to vector<2x1xf32>
    %73 = math.log %72 : vector<2x1xf32>
    %74 = arith.addf %73, %67 : vector<2x1xf32>
    %75 = vector.broadcast %74 : vector<2x1xf32> to vector<2x16xf32>
    %76 = arith.subf %65, %75 : vector<2x16xf32>
    %c0_44 = arith.constant 0 : index
    %c0_45 = arith.constant 0 : index
    %c0_46 = arith.constant 0 : index
    %77 = vector.load %arg15[%c0_44, %c0_45, %c0_46] : memref<2x2x16xf32, #tpu.memory_space<vmem>>, vector<1x2x16xf32>
    %78 = vector.shape_cast %77 : vector<1x2x16xf32> to vector<2x16xf32>
    %79 = arith.addf %76, %78 : vector<2x16xf32>
    %cst_47 = arith.constant 1.000000e+00 : f32
    %80 = vector.broadcast %cst_47 : f32 to vector<2x16xf32>
    %81 = arith.mulf %79, %80 : vector<2x16xf32>
    %cst_48 = arith.constant dense<0xFF800000> : vector<2xf32>
    %82 = vector.multi_reduction <maximumf>, %81, %cst_48 [1] : vector<2x16xf32> to vector<2xf32>
    %83 = vector.shape_cast %82 : vector<2xf32> to vector<2x1xf32>
    %84 = vector.broadcast %83 : vector<2x1xf32> to vector<2x16xf32>
    %85 = arith.cmpf oeq, %81, %84 : vector<2x16xf32>
    %c16_i32 = arith.constant 16 : i32
    %86 = vector.broadcast %c16_i32 : i32 to vector<2x16xi32>
    %87 = arith.select %85, %0, %86 : vector<2x16xi1>, vector<2x16xi32>
    %cst_49 = arith.constant dense<2147483647> : vector<2xi32>
    %88 = vector.multi_reduction <minsi>, %87, %cst_49 [1] : vector<2x16xi32> to vector<2xi32>
    %89 = vector.shape_cast %88 : vector<2xi32> to vector<2x1xi32>
    %90 = vector.broadcast %89 : vector<2x1xi32> to vector<2x16xi32>
    %91 = arith.cmpi eq, %0, %90 : vector<2x16xi32>
    %92 = arith.extui %91 : vector<2x16xi1> to vector<2x16xi32>
    %93 = arith.sitofp %92 : vector<2x16xi32> to vector<2x16xf32>
    %c1 = arith.constant 1 : index
    %c0_50 = arith.constant 0 : index
    %c0_51 = arith.constant 0 : index
    %94 = vector.load %arg16[%c1, %c0_50, %c0_51] : memref<4x2x16xf32, #tpu.memory_space<vmem>>, vector<1x2x16xf32>
    %95 = vector.shape_cast %94 : vector<1x2x16xf32> to vector<2x16xf32>
    %96 = vector.shape_cast %93 : vector<2x16xf32> to vector<1x2x16xf32>
    tpu.vector_store %arg16[%c1, %c0_50, %c0_51], %96 {strides = array<i32>} : memref<4x2x16xf32, #tpu.memory_space<vmem>>, vector<1x2x16xf32>,
    %97 = arith.mulf %93, %8 : vector<2x16xf32>
    %cst_52 = arith.constant dense<0.000000e+00> : vector<2xf32>
    %98 = vector.multi_reduction <add>, %97, %cst_52 [1] : vector<2x16xf32> to vector<2xf32>
    %99 = vector.shape_cast %98 : vector<2xf32> to vector<2x1xf32>
    %cst_53 = arith.constant 1.000000e+00 : f32
    %100 = vector.broadcast %cst_53 : f32 to vector<2x1xf32>
    %101 = arith.subf %100, %15 : vector<2x1xf32>
    %102 = arith.addf %16, %101 : vector<2x1xf32>
    %103 = arith.maximumf %15, %99 : vector<2x1xf32>
    %cst_54 = arith.constant dense<0.000000e+00> : vector<2x32xf32>
    %104 = tpu.matmul %93, %12, %cst_54 {dimension_numbers = #tpu.dot_dimension_numbers<[1], [0], [0], [1], [0, 0, 1, 1], [], []>} : vector<2x16xf32>, vector<16x32xf32>, vector<2x32xf32> -> vector<2x32xf32>
    %c0_55 = arith.constant 0 : index
    %c0_56 = arith.constant 0 : index
    %105 = vector.load %arg3[%c0_55, %c0_56] : memref<32x64xf32, #tpu.memory_space<vmem>>, vector<32x64xf32>
    %cst_57 = arith.constant dense<0.000000e+00> : vector<2x64xf32>
    %106 = tpu.matmul %104, %105, %cst_57 {dimension_numbers = #tpu.dot_dimension_numbers<[1], [0], [0], [1], [0, 0, 1, 1], [], []>} : vector<2x32xf32>, vector<32x64xf32>, vector<2x64xf32> -> vector<2x64xf32>
    %c0_58 = arith.constant 0 : index
    %c0_59 = arith.constant 0 : index
    %107 = vector.load %arg6[%c0_58, %c0_59] : memref<64x64xf32, #tpu.memory_space<vmem>>, vector<64x64xf32>
    %cst_60 = arith.constant dense<0.000000e+00> : vector<2x64xf32>
    %108 = tpu.matmul %60, %107, %cst_60 {dimension_numbers = #tpu.dot_dimension_numbers<[1], [0], [0], [1], [0, 0, 1, 1], [], []>} : vector<2x64xf32>, vector<64x64xf32>, vector<2x64xf32> -> vector<2x64xf32>
    %109 = arith.addf %106, %108 : vector<2x64xf32>
    %c0_61 = arith.constant 0 : index
    %c0_62 = arith.constant 0 : index
    %110 = vector.load %arg9[%c0_61, %c0_62] : memref<1x64xf32, #tpu.memory_space<vmem>>, vector<1x64xf32>
    %111 = vector.broadcast %110 : vector<1x64xf32> to vector<2x64xf32>
    %112 = arith.addf %109, %111 : vector<2x64xf32>
    %113 = arith.negf %112 : vector<2x64xf32>
    %114 = math.exp %113 : vector<2x64xf32>
    %cst_63 = arith.constant 1.000000e+00 : f32
    %115 = vector.broadcast %cst_63 : f32 to vector<2x64xf32>
    %116 = arith.addf %115, %114 : vector<2x64xf32>
    %117 = arith.divf %115, %116 : vector<2x64xf32>
    %c0_64 = arith.constant 0 : index
    %c0_65 = arith.constant 0 : index
    %118 = vector.load %arg4[%c0_64, %c0_65] : memref<32x64xf32, #tpu.memory_space<vmem>>, vector<32x64xf32>
    %cst_66 = arith.constant dense<0.000000e+00> : vector<2x64xf32>
    %119 = tpu.matmul %104, %118, %cst_66 {dimension_numbers = #tpu.dot_dimension_numbers<[1], [0], [0], [1], [0, 0, 1, 1], [], []>} : vector<2x32xf32>, vector<32x64xf32>, vector<2x64xf32> -> vector<2x64xf32>
    %c0_67 = arith.constant 0 : index
    %c0_68 = arith.constant 0 : index
    %120 = vector.load %arg7[%c0_67, %c0_68] : memref<64x64xf32, #tpu.memory_space<vmem>>, vector<64x64xf32>
    %cst_69 = arith.constant dense<0.000000e+00> : vector<2x64xf32>
    %121 = tpu.matmul %60, %120, %cst_69 {dimension_numbers = #tpu.dot_dimension_numbers<[1], [0], [0], [1], [0, 0, 1, 1], [], []>} : vector<2x64xf32>, vector<64x64xf32>, vector<2x64xf32> -> vector<2x64xf32>
    %122 = arith.addf %119, %121 : vector<2x64xf32>
    %c0_70 = arith.constant 0 : index
    %c0_71 = arith.constant 0 : index
    %123 = vector.load %arg10[%c0_70, %c0_71] : memref<1x64xf32, #tpu.memory_space<vmem>>, vector<1x64xf32>
    %124 = vector.broadcast %123 : vector<1x64xf32> to vector<2x64xf32>
    %125 = arith.addf %122, %124 : vector<2x64xf32>
    %126 = arith.negf %125 : vector<2x64xf32>
    %127 = math.exp %126 : vector<2x64xf32>
    %cst_72 = arith.constant 1.000000e+00 : f32
    %128 = vector.broadcast %cst_72 : f32 to vector<2x64xf32>
    %129 = arith.addf %128, %127 : vector<2x64xf32>
    %130 = arith.divf %128, %129 : vector<2x64xf32>
    %c0_73 = arith.constant 0 : index
    %c0_74 = arith.constant 0 : index
    %131 = vector.load %arg5[%c0_73, %c0_74] : memref<32x64xf32, #tpu.memory_space<vmem>>, vector<32x64xf32>
    %cst_75 = arith.constant dense<0.000000e+00> : vector<2x64xf32>
    %132 = tpu.matmul %104, %131, %cst_75 {dimension_numbers = #tpu.dot_dimension_numbers<[1], [0], [0], [1], [0, 0, 1, 1], [], []>} : vector<2x32xf32>, vector<32x64xf32>, vector<2x64xf32> -> vector<2x64xf32>
    %c0_76 = arith.constant 0 : index
    %c0_77 = arith.constant 0 : index
    %133 = vector.load %arg11[%c0_76, %c0_77] : memref<1x64xf32, #tpu.memory_space<vmem>>, vector<1x64xf32>
    %134 = vector.broadcast %133 : vector<1x64xf32> to vector<2x64xf32>
    %135 = arith.addf %132, %134 : vector<2x64xf32>
    %c0_78 = arith.constant 0 : index
    %c0_79 = arith.constant 0 : index
    %136 = vector.load %arg8[%c0_78, %c0_79] : memref<64x64xf32, #tpu.memory_space<vmem>>, vector<64x64xf32>
    %cst_80 = arith.constant dense<0.000000e+00> : vector<2x64xf32>
    %137 = tpu.matmul %60, %136, %cst_80 {dimension_numbers = #tpu.dot_dimension_numbers<[1], [0], [0], [1], [0, 0, 1, 1], [], []>} : vector<2x64xf32>, vector<64x64xf32>, vector<2x64xf32> -> vector<2x64xf32>
    %c0_81 = arith.constant 0 : index
    %c0_82 = arith.constant 0 : index
    %138 = vector.load %arg12[%c0_81, %c0_82] : memref<1x64xf32, #tpu.memory_space<vmem>>, vector<1x64xf32>
    %139 = vector.broadcast %138 : vector<1x64xf32> to vector<2x64xf32>
    %140 = arith.addf %137, %139 : vector<2x64xf32>
    %141 = arith.mulf %117, %140 : vector<2x64xf32>
    %142 = arith.addf %135, %141 : vector<2x64xf32>
    %143 = math.tanh %142 : vector<2x64xf32>
    %cst_83 = arith.constant 1.000000e+00 : f32
    %144 = vector.broadcast %cst_83 : f32 to vector<2x64xf32>
    %145 = arith.subf %144, %130 : vector<2x64xf32>
    %146 = arith.mulf %145, %143 : vector<2x64xf32>
    %147 = arith.mulf %130, %60 : vector<2x64xf32>
    %148 = arith.addf %146, %147 : vector<2x64xf32>
    %c0_84 = arith.constant 0 : index
    %c0_85 = arith.constant 0 : index
    %149 = vector.load %arg13[%c0_84, %c0_85] : memref<64x16xf32, #tpu.memory_space<vmem>>, vector<64x16xf32>
    %cst_86 = arith.constant dense<0.000000e+00> : vector<2x16xf32>
    %150 = tpu.matmul %148, %149, %cst_86 {dimension_numbers = #tpu.dot_dimension_numbers<[1], [0], [0], [1], [0, 0, 1, 1], [], []>} : vector<2x64xf32>, vector<64x16xf32>, vector<2x16xf32> -> vector<2x16xf32>
    %c0_87 = arith.constant 0 : index
    %c0_88 = arith.constant 0 : index
    %151 = vector.load %arg14[%c0_87, %c0_88] : memref<1x16xf32, #tpu.memory_space<vmem>>, vector<1x16xf32>
    %152 = vector.broadcast %151 : vector<1x16xf32> to vector<2x16xf32>
    %153 = arith.addf %150, %152 : vector<2x16xf32>
    %cst_89 = arith.constant dense<0xFF800000> : vector<2xf32>
    %154 = vector.multi_reduction <maximumf>, %153, %cst_89 [1] : vector<2x16xf32> to vector<2xf32>
    %155 = vector.shape_cast %154 : vector<2xf32> to vector<2x1xf32>
    %156 = vector.broadcast %155 : vector<2x1xf32> to vector<2x16xf32>
    %157 = arith.subf %153, %156 : vector<2x16xf32>
    %158 = math.exp %157 : vector<2x16xf32>
    %cst_90 = arith.constant dense<0.000000e+00> : vector<2xf32>
    %159 = vector.multi_reduction <add>, %158, %cst_90 [1] : vector<2x16xf32> to vector<2xf32>
    %160 = vector.shape_cast %159 : vector<2xf32> to vector<2x1xf32>
    %161 = math.log %160 : vector<2x1xf32>
    %162 = arith.addf %161, %155 : vector<2x1xf32>
    %163 = vector.broadcast %162 : vector<2x1xf32> to vector<2x16xf32>
    %164 = arith.subf %153, %163 : vector<2x16xf32>
    %c1_91 = arith.constant 1 : index
    %c0_92 = arith.constant 0 : index
    %c0_93 = arith.constant 0 : index
    %165 = vector.load %arg15[%c1_91, %c0_92, %c0_93] : memref<2x2x16xf32, #tpu.memory_space<vmem>>, vector<1x2x16xf32>
    %166 = vector.shape_cast %165 : vector<1x2x16xf32> to vector<2x16xf32>
    %167 = arith.addf %164, %166 : vector<2x16xf32>
    %cst_94 = arith.constant 1.000000e+00 : f32
    %168 = vector.broadcast %cst_94 : f32 to vector<2x16xf32>
    %169 = arith.mulf %167, %168 : vector<2x16xf32>
    %cst_95 = arith.constant dense<0xFF800000> : vector<2xf32>
    %170 = vector.multi_reduction <maximumf>, %169, %cst_95 [1] : vector<2x16xf32> to vector<2xf32>
    %171 = vector.shape_cast %170 : vector<2xf32> to vector<2x1xf32>
    %172 = vector.broadcast %171 : vector<2x1xf32> to vector<2x16xf32>
    %173 = arith.cmpf oeq, %169, %172 : vector<2x16xf32>
    %c16_i32_96 = arith.constant 16 : i32
    %174 = vector.broadcast %c16_i32_96 : i32 to vector<2x16xi32>
    %175 = arith.select %173, %0, %174 : vector<2x16xi1>, vector<2x16xi32>
    %cst_97 = arith.constant dense<2147483647> : vector<2xi32>
    %176 = vector.multi_reduction <minsi>, %175, %cst_97 [1] : vector<2x16xi32> to vector<2xi32>
    %177 = vector.shape_cast %176 : vector<2xi32> to vector<2x1xi32>
    %178 = vector.broadcast %177 : vector<2x1xi32> to vector<2x16xi32>
    %179 = arith.cmpi eq, %0, %178 : vector<2x16xi32>
    %180 = arith.extui %179 : vector<2x16xi1> to vector<2x16xi32>
    %181 = arith.sitofp %180 : vector<2x16xi32> to vector<2x16xf32>
    %c2 = arith.constant 2 : index
    %c0_98 = arith.constant 0 : index
    %c0_99 = arith.constant 0 : index
    %182 = vector.load %arg16[%c2, %c0_98, %c0_99] : memref<4x2x16xf32, #tpu.memory_space<vmem>>, vector<1x2x16xf32>
    %183 = vector.shape_cast %182 : vector<1x2x16xf32> to vector<2x16xf32>
    %184 = vector.shape_cast %181 : vector<2x16xf32> to vector<1x2x16xf32>
    tpu.vector_store %arg16[%c2, %c0_98, %c0_99], %184 {strides = array<i32>} : memref<4x2x16xf32, #tpu.memory_space<vmem>>, vector<1x2x16xf32>,
    %185 = arith.mulf %181, %8 : vector<2x16xf32>
    %cst_100 = arith.constant dense<0.000000e+00> : vector<2xf32>
    %186 = vector.multi_reduction <add>, %185, %cst_100 [1] : vector<2x16xf32> to vector<2xf32>
    %187 = vector.shape_cast %186 : vector<2xf32> to vector<2x1xf32>
    %cst_101 = arith.constant 1.000000e+00 : f32
    %188 = vector.broadcast %cst_101 : f32 to vector<2x1xf32>
    %189 = arith.subf %188, %103 : vector<2x1xf32>
    %190 = arith.addf %102, %189 : vector<2x1xf32>
    %191 = arith.maximumf %103, %187 : vector<2x1xf32>
    %c3 = arith.constant 3 : index
    %c0_102 = arith.constant 0 : index
    %c0_103 = arith.constant 0 : index
    %192 = vector.load %arg16[%c3, %c0_102, %c0_103] : memref<4x2x16xf32, #tpu.memory_space<vmem>>, vector<1x2x16xf32>
    %193 = vector.shape_cast %192 : vector<1x2x16xf32> to vector<2x16xf32>
    %194 = vector.shape_cast %8 : vector<2x16xf32> to vector<1x2x16xf32>
    tpu.vector_store %arg16[%c3, %c0_102, %c0_103], %194 {strides = array<i32>} : memref<4x2x16xf32, #tpu.memory_space<vmem>>, vector<1x2x16xf32>,
    %cst_104 = arith.constant 1.000000e+00 : f32
    %195 = vector.broadcast %cst_104 : f32 to vector<2x1xf32>
    %196 = arith.subf %195, %191 : vector<2x1xf32>
    %197 = arith.addf %190, %196 : vector<2x1xf32>
    %198 = arith.fptosi %197 : vector<2x1xf32> to vector<2x1xi32>
    %c0_105 = arith.constant 0 : index
    %c0_106 = arith.constant 0 : index
    %199 = vector.load %arg17[%c0_105, %c0_106] : memref<2x1xi32, #tpu.memory_space<vmem>>, vector<2x1xi32>
    tpu.vector_store %arg17[%c0_105, %c0_106], %198 {strides = array<i32>} : memref<2x1xi32, #tpu.memory_space<vmem>>, vector<2x1xi32>,
    return
  }
  func.func @transform_0(%arg0: i32) -> (i32, i32) {
    %c0_i32 = arith.constant 0 : i32
    %c0_i32_0 = arith.constant 0 : i32
    %c0_i32_1 = arith.constant 0 : i32
    return %c0_i32, %c0_i32_0 : i32, i32
  }
  func.func @transform_1(%arg0: i32) -> (i32, i32) {
    %c0_i32 = arith.constant 0 : i32
    %c0_i32_0 = arith.constant 0 : i32
    %c0_i32_1 = arith.constant 0 : i32
    return %c0_i32, %c0_i32_0 : i32, i32
  }
  func.func @transform_2(%arg0: i32) -> (i32, i32) {
    %c0_i32 = arith.constant 0 : i32
    %c0_i32_0 = arith.constant 0 : i32
    %c0_i32_1 = arith.constant 0 : i32
    return %c0_i32, %c0_i32_0 : i32, i32
  }
  func.func @transform_3(%arg0: i32) -> (i32, i32) {
    %c0_i32 = arith.constant 0 : i32
    %c0_i32_0 = arith.constant 0 : i32
    %c0_i32_1 = arith.constant 0 : i32
    return %c0_i32, %c0_i32_0 : i32, i32
  }
  func.func @transform_4(%arg0: i32) -> (i32, i32) {
    %c0_i32 = arith.constant 0 : i32
    %c0_i32_0 = arith.constant 0 : i32
    %c0_i32_1 = arith.constant 0 : i32
    return %c0_i32, %c0_i32_0 : i32, i32
  }
  func.func @transform_5(%arg0: i32) -> (i32, i32) {
    %c0_i32 = arith.constant 0 : i32
    %c0_i32_0 = arith.constant 0 : i32
    %c0_i32_1 = arith.constant 0 : i32
    return %c0_i32, %c0_i32_0 : i32, i32
  }
  func.func @transform_6(%arg0: i32) -> (i32, i32) {
    %c0_i32 = arith.constant 0 : i32
    %c0_i32_0 = arith.constant 0 : i32
    %c0_i32_1 = arith.constant 0 : i32
    return %c0_i32, %c0_i32_0 : i32, i32
  }
  func.func @transform_7(%arg0: i32) -> (i32, i32) {
    %c0_i32 = arith.constant 0 : i32
    %c0_i32_0 = arith.constant 0 : i32
    %c0_i32_1 = arith.constant 0 : i32
    return %c0_i32, %c0_i32_0 : i32, i32
  }
  func.func @transform_8(%arg0: i32) -> (i32, i32) {
    %c0_i32 = arith.constant 0 : i32
    %c0_i32_0 = arith.constant 0 : i32
    %c0_i32_1 = arith.constant 0 : i32
    return %c0_i32, %c0_i32_0 : i32, i32
  }
  func.func @transform_9(%arg0: i32) -> (i32, i32) {
    %c0_i32 = arith.constant 0 : i32
    %c0_i32_0 = arith.constant 0 : i32
    %c0_i32_1 = arith.constant 0 : i32
    return %c0_i32, %c0_i32_0 : i32, i32
  }
  func.func @transform_10(%arg0: i32) -> (i32, i32) {
    %c0_i32 = arith.constant 0 : i32
    %c0_i32_0 = arith.constant 0 : i32
    %c0_i32_1 = arith.constant 0 : i32
    return %c0_i32, %c0_i32_0 : i32, i32
  }
  func.func @transform_11(%arg0: i32) -> (i32, i32) {
    %c0_i32 = arith.constant 0 : i32
    %c0_i32_0 = arith.constant 0 : i32
    %c0_i32_1 = arith.constant 0 : i32
    return %c0_i32, %c0_i32_0 : i32, i32
  }
  func.func @transform_12(%arg0: i32) -> (i32, i32) {
    %c0_i32 = arith.constant 0 : i32
    %c0_i32_0 = arith.constant 0 : i32
    %c0_i32_1 = arith.constant 0 : i32
    return %c0_i32, %c0_i32_0 : i32, i32
  }
  func.func @transform_13(%arg0: i32) -> (i32, i32) {
    %c0_i32 = arith.constant 0 : i32
    %c0_i32_0 = arith.constant 0 : i32
    %c0_i32_1 = arith.constant 0 : i32
    return %c0_i32, %c0_i32_0 : i32, i32
  }
  func.func @transform_14(%arg0: i32) -> (i32, i32, i32) {
    %c0_i32 = arith.constant 0 : i32
    %c0_i32_0 = arith.constant 0 : i32
    %c0_i32_1 = arith.constant 0 : i32
    %c0_i32_2 = arith.constant 0 : i32
    return %c0_i32, %c0_i32_0, %c0_i32_1 : i32, i32, i32
  }
  func.func @transform_15(%arg0: i32) -> (i32, i32, i32) {
    %c0_i32 = arith.constant 0 : i32
    %c0_i32_0 = arith.constant 0 : i32
    %c0_i32_1 = arith.constant 0 : i32
    %c0_i32_2 = arith.constant 0 : i32
    return %c0_i32, %c0_i32_0, %c0_i32_1 : i32, i32, i32
  }
  func.func @transform_16(%arg0: i32) -> (i32, i32) {
    %c0_i32 = arith.constant 0 : i32
    %c0_i32_0 = arith.constant 0 : i32
    %c0_i32_1 = arith.constant 0 : i32
    return %c0_i32, %c0_i32_0 : i32, i32
  }
}

</mosaic_0001>

<bundles_post_ra>
// kernel: ecg_speaker_forward.4
= control target key start
LH: loop header
LB: loop body
LE: loop exit
PB: predicated region body
PF: predicated region fallthrough
CT: control target
= control target key end

     0   :  { %s747_s12 = smov 0   ;;  %s749_s13 = smov 0   ;;  %s865_s0 = inlined_call_operand.vmem [shape: bf16[4,32,512], index: 0, kind: input, shape index: {}]   ;;  %s866_s1 = inlined_call_operand.vmem [shape: bf16[8,32], index: 1, kind: input, shape index: {}]   ;;  %s867_s2 = inlined_call_operand.vmem [shape: f32[8,1], index: 2, kind: input, shape index: {}]   ;;  %s868_s3 = inlined_call_operand.vmem [shape: f32[8,512], index: 3, kind: output, shape index: {}]  }
   0x1   :  { %s751_s14 = smov 0  }
   0x2 LB: > { %s562_s15 = sadd.s32 4294967295, %s724_s14   ;;  %s764_s16 = sadd.s32 1, %s724_s14   ;;  %s724_s14 = sphi %s751_s14, %s871_s14   ;;  %s720_s13 = sphi %s749_s13, %s870_s13   ;;  %s716_s12 = sphi %s747_s12, %s869_s12  }
   0x3   : > { %s17_s17 = ssub.s32 %s724_s14, %s764_s16  ;;  %s20_s18 = sadd.s32 1, %s720_s13 }
   0x4   : > { %p18_p0 = scmp.eq.s32.totalorder %s17_s17, 0  ;;  %p27_p1 = scmp.ne.s32.totalorder %s720_s13, %s716_s12 }
   0x5   : > { %p28_p2 = scmp.eq.s32.totalorder %s724_s14, 0  ;;  %p565_p4 = scmp.ge.s32.totalorder %s724_s14, 2 }
   0x6   : > { %s773_s19 = scalar_select %p18_p0, %s720_s13, %s20_s18  }
   0x7   : > { %p29_p3 = por %p28_p2, %p27_p1  ;;  %127 = sbr.rel (%p565_p4) target bundleno = 32 (0x20), region = 24 }
   0xc   : > { %130 = sbr.rel (!%p29_p3) target bundleno = 32 (0x20), region = 28  ;;  %s132_s20 = sand.u32 (%p29_p3), 1, %s720_s13  }
   0xd   : > { %s659_s21 = sshll.u32 (%p29_p3), %s724_s14, 3  ;;  %s566_s22 = sshll.u32 (%p29_p3), %s132_s20, 7 }
   0xe   : > { %s781_s25 = scalar_lea.vmem (%p29_p3), %s865_s0, %s659_s21  ;;  %s134_s26 = scalar_lea.vmem (%p29_p3), [#allocation2], %s566_s22 }
   0xf   : > { %v196_v0 = vld [vmem:[%s781_s25] sm:$0xff] (%p29_p3)  ;;  %v198_v1 = vld [vmem:[%s781_s25 + $0x10] sm:$0xff] (%p29_p3) }
  0x10   : > { %v200_v2 = vld [vmem:[%s781_s25 + $0x20] sm:$0xff] (%p29_p3)  ;;  %197 = vst [vmem:[%s134_s26] sm:$0xff] (%p29_p3), %v196_v0  ;;  %v202_v3 = vld [vmem:[%s781_s25 + $0x30] sm:$0xff] (%p29_p3) }
  0x11   : > { %199 = vst [vmem:[%s134_s26 + $0x8] sm:$0xff] %v198_v1  ;;  %v204_v4 = vld [vmem:[%s781_s25 + $0x40] sm:$0xff]  ;;  %v206_v5 = vld [vmem:[%s781_s25 + $0x50] sm:$0xff] }
  0x12   : > { %201 = vst [vmem:[%s134_s26 + $0x10] sm:$0xff] %v200_v2  ;;  %v208_v6 = vld [vmem:[%s781_s25 + $0x60] sm:$0xff]  ;;  %v210_v7 = vld [vmem:[%s781_s25 + $0x70] sm:$0xff] }
  0x13   : > { %203 = vst [vmem:[%s134_s26 + $0x18] sm:$0xff] %v202_v3  ;;  %v212_v8 = vld [vmem:[%s781_s25 + $0x80] sm:$0xff]  ;;  %v214_v9 = vld [vmem:[%s781_s25 + $0x90] sm:$0xff] }
  0x14   : > { %205 = vst [vmem:[%s134_s26 + $0x20] sm:$0xff] %v204_v4  ;;  %v216_v10 = vld [vmem:[%s781_s25 + $0xa0] sm:$0xff]  ;;  %v218_v11 = vld [vmem:[%s781_s25 + $0xb0] sm:$0xff] }
  0x15   : > { %207 = vst [vmem:[%s134_s26 + $0x28] sm:$0xff] %v206_v5  ;;  %v220_v12 = vld [vmem:[%s781_s25 + $0xc0] sm:$0xff]  ;;  %v222_v13 = vld [vmem:[%s781_s25 + $0xd0] sm:$0xff] }
  0x16   : > { %209 = vst [vmem:[%s134_s26 + $0x30] sm:$0xff] %v208_v6  ;;  %v224_v14 = vld [vmem:[%s781_s25 + $0xe0] sm:$0xff]  ;;  %v226_v15 = vld [vmem:[%s781_s25 + $0xf0] sm:$0xff] }
  0x17   : > { %211 = vst [vmem:[%s134_s26 + $0x38] sm:$0xff] %v210_v7 }
  0x18   : > { %213 = vst [vmem:[%s134_s26 + $0x40] sm:$0xff] %v212_v8 }
  0x19   : > { %215 = vst [vmem:[%s134_s26 + $0x48] sm:$0xff] %v214_v9 }
  0x1a   : > { %217 = vst [vmem:[%s134_s26 + $0x50] sm:$0xff] %v216_v10 }
  0x1b   : > { %219 = vst [vmem:[%s134_s26 + $0x58] sm:$0xff] %v218_v11 }
  0x1c   : > { %221 = vst [vmem:[%s134_s26 + $0x60] sm:$0xff] %v220_v12 }
  0x1d   : > { %223 = vst [vmem:[%s134_s26 + $0x68] sm:$0xff] %v222_v13 }
  0x1e   : > { %225 = vst [vmem:[%s134_s26 + $0x70] sm:$0xff] %v224_v14 }
  0x1f   : > { %227 = vst [vmem:[%s134_s26 + $0x78] sm:$0xff] %v226_v15 }
  0x20 PF: > { %p569_p5 = scmp.ge.s32.totalorder %s724_s14, 1  ;;  %p232_p6 = scmp.lt.s32.totalorder %s724_s14, 3 }
  0x22   : > { %p233_p7 = pnand %p569_p5, %p232_p6 }
  0x23   : > { %s239_s27 = sand.u32 (!%p233_p7), 1, %s716_s12   ;;  %s571_s7 = sshll.u32 (!%p233_p7), %s562_s15, 1 }
  0x24   : > { %236 = sbr.rel (%p233_p7) target bundleno = 210 (0xd2), region = 66  ;;  %s570_s30 = sshll.u32 (!%p233_p7), %s239_s27, 7 }
  0x25   : > { %s805_s4 = scalar_lea.vmem (!%p233_p7), [#allocation2], %s570_s30  ;;  %p264_p8 = scmp.lt.s32.totalorder (!%p233_p7), %s571_s7, 3 }
  0x29   : > { %v271_v16 = vld [vmem:[%s867_s2] sm:$0xff]  ;;  %v726_v17 = vmov 0   ;;  %vm301_vm0 = vcmask 261120   ;;  %v583_v18 = vld [vmem:[%s805_s4 + $0x10] sm:$0xf]  ;;  %s873_s7 = smov (!%p264_p8, %s571_s7), 3 }
  0x2a   : > { %701 = vset.pattern.permute.xlu0 %v726_v17  ;;  %v663_v19 = vld [vmem:[%s805_s4 + $0x14] sm:$0xf0]  ;;  %v662_v20 = vld [vmem:[%s805_s4 + $0x14] sm:$0xf]  ;;  %v585_v22 = vld [vmem:[%s805_s4 + $0x18] sm:$0xf0] }
  0x2b   : > { %278 = vperm.xlu0 %701, %v271_v16   ;;  %v584_v21 = vor.u32 %v663_v19, %v583_v18  ;;  %v605_v23 = vld [vmem:[%s805_s4 + $0x30] sm:$0xf]  ;;  %v667_v24 = vld [vmem:[%s805_s4 + $0x34] sm:$0xf0]  ;;  %v588_v25 = vor.u32 %v662_v20, %v585_v22  ;;  %v666_v27 = vld [vmem:[%s805_s4 + $0x34] sm:$0xf] }
  0x2c   : > { %v606_v26 = vor.u32 %v667_v24, %v605_v23  ;;  %v607_v28 = vld [vmem:[%s805_s4 + $0x38] sm:$0xf0]  ;;  %v575_v29 = vld [vmem:[%s805_s4] sm:$0xf]  ;;  %v661_v31 = vld [vmem:[%s805_s4 + $0x4] sm:$0xf0] }
  0x2d   : > { %311 = vmatpush.bf16.msra.mxu0 %v584_v21  ;;  %v610_v30 = vor.u32 %v666_v27, %v607_v28  ;;  %v660_v32 = vld [vmem:[%s805_s4 + $0x4] sm:$0xf]  ;;  %v577_v33 = vld [vmem:[%s805_s4 + $0x8] sm:$0xf0]  ;;  %324 = vmatpush.bf16.msra.mxu1 %v588_v25  ;;  %v576_v34 = vor.u32 %v661_v31, %v575_v29  ;;  %v597_v36 = vld [vmem:[%s805_s4 + $0x20] sm:$0xf] }
  0x2e   : > { %364 = vmatpush.bf16.msra.mxu2 %v606_v26  ;;  %v580_v35 = vor.u32 %v660_v32, %v577_v33  ;;  %v665_v37 = vld [vmem:[%s805_s4 + $0x24] sm:$0xf0]  ;;  %v664_v38 = vld [vmem:[%s805_s4 + $0x24] sm:$0xf]  ;;  %v599_v40 = vld [vmem:[%s805_s4 + $0x28] sm:$0xf0] }
  0x2f   : > { %377 = vmatpush.bf16.msra.mxu3 %v610_v30  ;;  %v598_v39 = vor.u32 %v665_v37, %v597_v36  ;;  %v270_v41 = vld [vmem:[%s866_s1] sm:$0xf]  ;;  %v649_v42 = vld [vmem:[%s805_s4 + $0x70] sm:$0xf]  ;;  %v675_v43 = vld [vmem:[%s805_s4 + $0x74] sm:$0xf0]  ;;  %v602_v44 = vor.u32 %v664_v38, %v599_v40 }
  0x30   : > { %v650_v45 = vor.u32 %v675_v43, %v649_v42  ;;  %v674_v46 = vld [vmem:[%s805_s4 + $0x74] sm:$0xf]  ;;  %v651_v47 = vld [vmem:[%s805_s4 + $0x78] sm:$0xf0]  ;;  %v627_v48 = vld [vmem:[%s805_s4 + $0x50] sm:$0xf] }
  0x31   : > { %312 = vmatpush.bf16.msra.mxu0 %v576_v34  ;;  %v654_v49 = vor.u32 %v674_v46, %v651_v47  ;;  %v671_v50 = vld [vmem:[%s805_s4 + $0x54] sm:$0xf0]  ;;  %v670_v51 = vld [vmem:[%s805_s4 + $0x54] sm:$0xf]  ;;  %v629_v52 = vld [vmem:[%s805_s4 + $0x58] sm:$0xf0]  ;;  %325 = vmatpush.bf16.msra.mxu1 %v580_v35 }
  0x32   : > { %365 = vmatpush.bf16.msra.mxu2 %v598_v39  ;;  %v628_v53 = vor.u32 %v671_v50, %v627_v48  ;;  %v641_v54 = vld [vmem:[%s805_s4 + $0x60] sm:$0xf]  ;;  %v673_v55 = vld [vmem:[%s805_s4 + $0x64] sm:$0xf0]  ;;  %v672_v56 = vld [vmem:[%s805_s4 + $0x64] sm:$0xf]  ;;  %v632_v57 = vor.u32 %v670_v51, %v629_v52 }
  0x33   : > { %378 = vmatpush.bf16.msra.mxu3 %v602_v44  ;;  %v642_v58 = vor.u32 %v673_v55, %v641_v54  ;;  %v643_v59 = vld [vmem:[%s805_s4 + $0x68] sm:$0xf0]  ;;  %v619_v60 = vld [vmem:[%s805_s4 + $0x40] sm:$0xf]  ;;  %v669_v61 = vld [vmem:[%s805_s4 + $0x44] sm:$0xf0] }
  0x34   : > { %589 = vmatmul.msk.bf16.vlgmr.msra.gmra.mxu0 %vm301_vm0, %v270_v41  ;;  %v646_v62 = vor.u32 %v672_v56, %v643_v59  ;;  %v668_v63 = vld [vmem:[%s805_s4 + $0x44] sm:$0xf]  ;;  %v621_v0 = vld [vmem:[%s805_s4 + $0x48] sm:$0xf0]  ;;  %590 = vmatmul.msk.bf16.vlgmr.msra.gmra.mxu1 %vm301_vm0, %v270_v41  ;;  %v620_v1 = vor.u32 %v669_v61, %v619_v60  ;;  %s572_s8 = sshll.u32 %s873_s7, 3 }
  0x35   : > { %611 = vmatmul.msk.bf16.vlgmr.msra.gmra.mxu2 %vm301_vm0, %v270_v41  ;;  %419 = vmatpush.bf16.msrb.mxu0 %v628_v53  ;;  %v624_v2 = vor.u32 %v668_v63, %v621_v0  ;;  %s267_s11 = scalar_lea.vmem %s868_s3, %s572_s8 }
  0x36   : > { %474 = vmatpush.bf16.msrb.mxu2 %v650_v45  ;;  %612 = vmatmul.msk.bf16.vlgmr.msra.gmra.mxu3 %vm301_vm0, %v270_v41 }
  0x37   : > { %487 = vmatpush.bf16.msrb.mxu3 %v654_v49  ;;  %432 = vmatpush.bf16.msrb.mxu1 %v632_v57 }
  0x39   : > { %420 = vmatpush.bf16.msrb.mxu0 %v620_v1 }
  0x3a   : > { %475 = vmatpush.bf16.msrb.mxu2 %v642_v58 }
  0x3b   : > { %488 = vmatpush.bf16.msrb.mxu3 %v646_v62  ;;  %433 = vmatpush.bf16.msrb.mxu1 %v624_v2 }
  0x44   : > { %633 = vmatmul.msk.bf16.vlgmr.msrb.gmra.mxu0 %vm301_vm0, %v270_v41  ;;  %634 = vmatmul.msk.bf16.vlgmr.msrb.gmra.mxu1 %vm301_vm0, %v270_v41 }
  0x45   : > { %655 = vmatmul.msk.bf16.vlgmr.msrb.gmra.mxu2 %vm301_vm0, %v270_v41 }
  0x46   : > { %656 = vmatmul.msk.bf16.vlgmr.msrb.gmra.mxu3 %vm301_vm0, %v270_v41 }
  0x9d   : > { %v279_v9 = vpop.permute.xlu0 %278 }
  0xb1   : > { %v314_v3 = vpop.f32.mrf.mxu0  ;;  %v327_v4 = vpop.f32.mrf.mxu1 }
  0xb2   : > { %v328_v14 = vadd.f32 %v327_v4, %v279_v9  ;;  %v315_v17 = vadd.f32 %v314_v3, %v279_v9 }
  0xb4   : > { %v332_v21 = vmax.f32 %v328_v14, 0.0  ;;  %v331_v23 = vmax.f32 %v315_v17, 0.0 }
  0xb8   : > { %v367_v5 = vpop.f32.mrf.mxu2 }
  0xb9   : > { %v380_v6 = vpop.f32.mrf.mxu3  ;;  %v316_v7 = vpop.f32.mrf.mxu0  ;;  %v368_v11 = vadd.f32 %v367_v5, %v279_v9 }
  0xba   : > { %v329_v8 = vpop.f32.mrf.mxu1  ;;  %v381_v15 = vadd.f32 %v380_v6, %v279_v9 }
  0xbb   : > { %v384_v20 = vmax.f32 %v368_v11, 0.0 }
  0xbc   : > { %v385_v22 = vmax.f32 %v381_v15, 0.0 }
  0xbd   : > { %v386_v27 = vmax.f32 %v331_v23, %v384_v20 }
  0xbe   : > { %v387_v31 = vmax.f32 %v332_v21, %v385_v22 }
  0xc0   : > { %v369_v10 = vpop.f32.mrf.mxu2 }
  0xc1   : > { %v382_v12 = vpop.f32.mrf.mxu3  ;;  %v422_v13 = vpop.f32.mrf.mxu0 }
  0xc2   : > { %v435_v16 = vpop.f32.mrf.mxu1  ;;  %v423_v18 = vadd.f32 %v422_v13, %v279_v9 }
  0xc3   : > { %v436_v19 = vadd.f32 %v435_v16, %v279_v9 }
  0xc4   : > { %v439_v24 = vmax.f32 %v423_v18, 0.0 }
  0xc5   : > { %v440_v25 = vmax.f32 %v436_v19, 0.0 }
  0xc6   : > { %v441_v34 = vmax.f32 %v386_v27, %v439_v24 }
  0xc7   : > { %v442_v36 = vmax.f32 %v387_v31, %v440_v25 }
  0xc8   : > { %v477_v26 = vpop.f32.mrf.mxu2 }
  0xc9   : > { %v478_v28 = vadd.f32 %v477_v26, %v279_v9  ;;  %v490_v29 = vpop.f32.mrf.mxu3  ;;  %v424_v30 = vpop.f32.mrf.mxu0 }
  0xca   : > { %v491_v32 = vadd.f32 %v490_v29, %v279_v9  ;;  %v437_v33 = vpop.f32.mrf.mxu1 }
  0xcb   : > { %v494_v35 = vmax.f32 %v478_v28, 0.0 }
  0xcc   : > { %v495_v37 = vmax.f32 %v491_v32, 0.0 }
  0xcd   : > { %v496_v38 = vmax.f32 %v441_v34, %v494_v35 }
  0xce   : > { %v497_v39 = vmax.f32 %v442_v36, %v495_v37 }
  0xcf   : > { %498 = vst [vmem:[%s267_s11] sm:$0xff] %v496_v38 }
  0xd0   : > { %499 = vst [vmem:[%s267_s11 + $0x8] sm:$0xff] %v497_v39  ;;  %v479_v40 = vpop.f32.mrf.mxu2 }
  0xd1   : > { %v492_v41 = vpop.f32.mrf.mxu3 }
  0xd2 PF: > { %p10_p9 = scmp.ge.s32.totalorder %s764_s16, 4   ;;  %s869_s12 = smov %s720_s13 }
  0xd3   : > { %s870_s13 = smov %s773_s19  ;;  %s871_s14 = smov %s764_s16 }
  0xd4   :  { %12 = sbr.rel (!%p10_p9) target bundleno = 2 (0x2), region = 108 }

// kernel: ecg_speaker_forward.5
= control target key start
LH: loop header
LB: loop body
LE: loop exit
PB: predicated region body
PF: predicated region fallthrough
CT: control target
= control target key end

     0   :  { %v363_v3 = vmov 0   ;;  %vm62_vm0 = vcmask 1043456   ;;  %vm58_vm1 = vcmask 588800   ;;  %s453_s0 = inlined_call_operand.vmem [shape: bf16[4,72,128], index: 0, kind: input, shape index: {}]   ;;  %s454_s2 = inlined_call_operand.vmem [shape: f32[8,1], index: 2, kind: input, shape index: {}]   ;;  %s455_s1 = inlined_call_operand.vmem [shape: bf16[8,72], index: 1, kind: input, shape index: {}]   ;;  %s456_s3 = inlined_call_operand.vmem [shape: f32[8,128], index: 3, kind: output, shape index: {}]  }
   0x1   :  { %v25_v0 = vld [vmem:[%s453_s0 + $0x20] sm:$0xf]  ;;  %v275_v1 = vld [vmem:[%s453_s0 + $0x44] sm:$0xf]  ;;  %v301_v2 = vld [vmem:[%s453_s0 + $0x68] sm:$0xf]  ;;  %362 = vset.pattern.permute.xlu0 %v363_v3 }
   0x2   :  { %v48_v4 = vunpack.c.l.b16 %v25_v0  ;;  %v107_v5 = vunpack.c.l.b16 %v275_v1  ;;  %v162_v6 = vunpack.c.l.b16 %v301_v2  ;;  %v327_v7 = vld [vmem:[%s453_s0 + $0x8c] sm:$0xf]  ;;  %v348_v17 = vld [vmem:[%s453_s0 + $0x18] sm:$0xff]  ;;  %v356_v19 = vld [vmem:[%s453_s0 + $0x60] sm:$0xff] }
   0x3   :  { %v217_v8 = vunpack.c.l.b16 %v327_v7  ;;  %v352_v18 = vld [vmem:[%s453_s0 + $0x3c] sm:$0xff]  ;;  %v360_v20 = vld [vmem:[%s453_s0 + $0x84] sm:$0xff]  ;;  %v347_v22 = vld [vmem:[%s453_s0 + $0x10] sm:$0xff] }
   0x4   :  { %v53_v9 = vpack.c.b16 %v48_v4, %v48_v4  ;;  %v112_v10 = vpack.c.b16 %v107_v5, %v107_v5  ;;  %v167_v11 = vpack.c.b16 %v162_v6, %v162_v6  ;;  %v16_v21 = vld [vmem:[%s454_s2] sm:$0xff]  ;;  %v351_v23 = vld [vmem:[%s453_s0 + $0x34] sm:$0xff]  ;;  %v346_v26 = vld [vmem:[%s453_s0 + $0x8] sm:$0xff] }
   0x5   :  { %v222_v12 = vpack.c.b16 %v217_v8, %v217_v8  ;;  %28 = vperm.xlu0 %362, %v16_v21   ;;  %v355_v24 = vld [vmem:[%s453_s0 + $0x58] sm:$0xff]  ;;  %v350_v27 = vld [vmem:[%s453_s0 + $0x2c] sm:$0xff]  ;;  %v345_v30 = vld [vmem:[%s453_s0] sm:$0xff] }
   0x6   :  { %v64_v13 = vsel %vm62_vm0, %v53_v9, 0  ;;  %v118_v14 = vsel %vm62_vm0, %v112_v10, 0  ;;  %v173_v15 = vsel %vm62_vm0, %v167_v11, 0  ;;  %v359_v25 = vld [vmem:[%s453_s0 + $0x7c] sm:$0xff]  ;;  %v354_v28 = vld [vmem:[%s453_s0 + $0x50] sm:$0xff]  ;;  %v349_v31 = vld [vmem:[%s453_s0 + $0x24] sm:$0xff] }
   0x7   :  { %69 = vmatpush.bf16.msra.mxu0 %v64_v13  ;;  %123 = vmatpush.bf16.msra.mxu1 %v118_v14  ;;  %v228_v16 = vsel %vm62_vm0, %v222_v12, 0  ;;  %v358_v29 = vld [vmem:[%s453_s0 + $0x74] sm:$0xff]  ;;  %v353_v32 = vld [vmem:[%s453_s0 + $0x48] sm:$0xff]  ;;  %v15_v34 = vld [vmem:[%s455_s1] sm:$0xf] }
   0x8   :  { %178 = vmatpush.bf16.msra.mxu2 %v173_v15  ;;  %233 = vmatpush.bf16.msra.mxu3 %v228_v16  ;;  %v357_v33 = vld [vmem:[%s453_s0 + $0x6c] sm:$0xff] }
   0xb   :  { %70 = vmatpush.bf16.msra.mxu0 %v348_v17  ;;  %124 = vmatpush.bf16.msra.mxu1 %v352_v18 }
   0xc   :  { %179 = vmatpush.bf16.msra.mxu2 %v356_v19  ;;  %234 = vmatpush.bf16.msra.mxu3 %v360_v20 }
   0xf   :  { %71 = vmatpush.bf16.msra.mxu0 %v347_v22  ;;  %125 = vmatpush.bf16.msra.mxu1 %v351_v23 }
  0x10   :  { %180 = vmatpush.bf16.msra.mxu2 %v355_v24  ;;  %235 = vmatpush.bf16.msra.mxu3 %v359_v25 }
  0x13   :  { %72 = vmatpush.bf16.msra.mxu0 %v346_v26  ;;  %126 = vmatpush.bf16.msra.mxu1 %v350_v27 }
  0x14   :  { %181 = vmatpush.bf16.msra.mxu2 %v354_v28  ;;  %236 = vmatpush.bf16.msra.mxu3 %v358_v29 }
  0x17   :  { %73 = vmatpush.bf16.msra.mxu0 %v345_v30  ;;  %127 = vmatpush.bf16.msra.mxu1 %v349_v31 }
  0x18   :  { %182 = vmatpush.bf16.msra.mxu2 %v353_v32  ;;  %237 = vmatpush.bf16.msra.mxu3 %v357_v33 }
  0x1a   :  { %266 = vmatmul.msk.bf16.vlgmr.msra.gmra.mxu0 %vm58_vm1, %v15_v34  ;;  %292 = vmatmul.msk.bf16.vlgmr.msra.gmra.mxu1 %vm58_vm1, %v15_v34 }
  0x1b   :  { %318 = vmatmul.msk.bf16.vlgmr.msra.gmra.mxu2 %vm58_vm1, %v15_v34  ;;  %344 = vmatmul.msk.bf16.vlgmr.msra.gmra.mxu3 %vm58_vm1, %v15_v34 }
  0x77   :  { %v29_v35 = vpop.permute.xlu0 %28 }
  0x97   :  { %v75_v36 = vpop.f32.mrf.mxu0  ;;  %v129_v37 = vpop.f32.mrf.mxu1 }
  0x98   :  { %v76_v38 = vadd.f32 %v75_v36, %v29_v35  ;;  %v130_v39 = vadd.f32 %v129_v37, %v29_v35 }
  0x9a   :  { %v79_v40 = vmax.f32 %v76_v38, 0.0  ;;  %v133_v41 = vmax.f32 %v130_v39, 0.0 }
  0x9c   :  { %v134_v44 = vmax.f32 %v79_v40, %v133_v41 }
  0x9e   :  { %v184_v42 = vpop.f32.mrf.mxu2  ;;  %v239_v43 = vpop.f32.mrf.mxu3 }
  0x9f   :  { %v185_v45 = vadd.f32 %v184_v42, %v29_v35  ;;  %v240_v46 = vadd.f32 %v239_v43, %v29_v35  ;;  %v77_v47 = vpop.f32.mrf.mxu0  ;;  %v131_v48 = vpop.f32.mrf.mxu1 }
  0xa1   :  { %v188_v49 = vmax.f32 %v185_v45, 0.0  ;;  %v243_v51 = vmax.f32 %v240_v46, 0.0 }
  0xa3   :  { %v189_v50 = vmax.f32 %v134_v44, %v188_v49 }
  0xa5   :  { %v244_v52 = vmax.f32 %v189_v50, %v243_v51 }
  0xa6   :  { %v186_v53 = vpop.f32.mrf.mxu2  ;;  %v241_v54 = vpop.f32.mrf.mxu3 }
  0xa7   :  { %245 = vst [vmem:[%s456_s3] sm:$0xff] %v244_v52 }

// kernel: ecg_speaker_forward.6
= control target key start
LH: loop header
LB: loop body
LE: loop exit
PB: predicated region body
PF: predicated region fallthrough
CT: control target
= control target key end

     0   :  { %vm72_vm0 = vcmask 25600   ;;  %v24_v0 = vlaneseq  ;;  %vm39_vm1 = vcmask 1043456   ;;  %vm185_vm10 = vcmask 1041409   ;;  %s499_s1 = inlined_call_operand.vmem [shape: f32[2,4], index: 1, kind: input, shape index: {}]   ;;  %s500_s2 = inlined_call_operand.vmem [shape: f32[128,64], index: 2, kind: input, shape index: {}]   ;;  %s501_s3 = inlined_call_operand.vmem [shape: f32[128,64], index: 3, kind: input, shape index: {}]   ;;  %s502_s0 = inlined_call_operand.vmem [shape: f32[2,4,128], index: 0, kind: input, shape index: {}]   ;;  %s503_s4 = inlined_call_operand.vmem [shape: f32[1,64], index: 4, kind: input, shape index: {}]   ;;  %s504_s5 = inlined_call_operand.vmem [shape: f32[2,64], index: 5, kind: output, shape index: {}]  }
   0x1   :  { %v22_v1 = vld [vmem:[%s499_s1] sm:$0x3]  ;;  %v165_v8 = vld [vmem:[%s500_s2 + $0x78] sm:$0xff]  ;;  %v164_v10 = vld [vmem:[%s500_s2 + $0x70] sm:$0xff] }
   0x2   :  { %v73_v2 = vsel %vm72_vm0, %v22_v1, 0.0  ;;  %v25_v3 = vshrl.u32 %v24_v0, 7  ;;  %v77_v4 = vsub.f32 1.0, %v22_v1  ;;  %v30_v6 = vperm.slane %v22_v1, 1  ;;  %213 = vmatpush.msra.mxu1 %v165_v8  ;;  %v181_v9 = vld [vmem:[%s501_s3 + $0x78] sm:$0xff]  ;;  %v180_v11 = vld [vmem:[%s501_s3 + $0x70] sm:$0xff] }
   0x3   :  { %74 = vadd.xlane.f32.xlu0 %v73_v2  ;;  %v23_v7 = vperm.slane %v22_v1, 0  ;;  %188 = vmatpush.msra.mxu0 %v181_v9  ;;  %v163_v12 = vld [vmem:[%s500_s2 + $0x68] sm:$0xff]  ;;  %v162_v14 = vld [vmem:[%s500_s2 + $0x60] sm:$0xff]  ;;  %v161_v16 = vld [vmem:[%s500_s2 + $0x58] sm:$0xff] }
   0x4   :  { %244 = vset.pattern.permute.xlu1 %v25_v3  ;;  %245 = vset.pattern.permute.xlu0 %v25_v3  ;;  %v78_v5 = vsel %vm72_vm0, %v77_v4, 0.0  ;;  %v179_v13 = vld [vmem:[%s501_s3 + $0x68] sm:$0xff]  ;;  %v178_v15 = vld [vmem:[%s501_s3 + $0x60] sm:$0xff]  ;;  %v177_v17 = vld [vmem:[%s501_s3 + $0x58] sm:$0xff] }
   0x5   :  { %214 = vmatpush.msra.mxu1 %v164_v10  ;;  %189 = vmatpush.msra.mxu0 %v180_v11  ;;  %v160_v18 = vld [vmem:[%s500_s2 + $0x50] sm:$0xff]  ;;  %v159_v20 = vld [vmem:[%s500_s2 + $0x48] sm:$0xff]  ;;  %v158_v22 = vld [vmem:[%s500_s2 + $0x40] sm:$0xff] }
   0x6   :  { %v176_v19 = vld [vmem:[%s501_s3 + $0x50] sm:$0xff]  ;;  %v175_v21 = vld [vmem:[%s501_s3 + $0x48] sm:$0xff]  ;;  %v174_v23 = vld [vmem:[%s501_s3 + $0x40] sm:$0xff] }
   0x7   :  { %215 = vmatpush.msra.mxu1 %v163_v12  ;;  %190 = vmatpush.msra.mxu0 %v179_v13  ;;  %v157_v24 = vld [vmem:[%s500_s2 + $0x38] sm:$0xff]  ;;  %v156_v26 = vld [vmem:[%s500_s2 + $0x30] sm:$0xff]  ;;  %v155_v28 = vld [vmem:[%s500_s2 + $0x28] sm:$0xff] }
   0x8   :  { %v173_v25 = vld [vmem:[%s501_s3 + $0x38] sm:$0xff]  ;;  %v172_v27 = vld [vmem:[%s501_s3 + $0x30] sm:$0xff]  ;;  %v171_v29 = vld [vmem:[%s501_s3 + $0x28] sm:$0xff] }
   0x9   :  { %216 = vmatpush.msra.mxu1 %v162_v14  ;;  %191 = vmatpush.msra.mxu0 %v178_v15  ;;  %v154_v30 = vld [vmem:[%s500_s2 + $0x20] sm:$0xff]  ;;  %v153_v32 = vld [vmem:[%s500_s2 + $0x18] sm:$0xff]  ;;  %v152_v34 = vld [vmem:[%s500_s2 + $0x10] sm:$0xff] }
   0xa   :  { %v170_v31 = vld [vmem:[%s501_s3 + $0x20] sm:$0xff]  ;;  %v169_v33 = vld [vmem:[%s501_s3 + $0x18] sm:$0xff]  ;;  %v168_v35 = vld [vmem:[%s501_s3 + $0x10] sm:$0xff] }
   0xb   :  { %79 = vadd.xlane.f32.xlu0 %v78_v5  ;;  %217 = vmatpush.msra.mxu1 %v161_v16  ;;  %v151_v36 = vld [vmem:[%s500_s2 + $0x8] sm:$0xff]  ;;  %v150_v38 = vld [vmem:[%s500_s2] sm:$0xff] }
   0xc   :  { %35 = vperm.xlu1 %244, %v30_v6   ;;  %192 = vmatpush.msra.mxu0 %v177_v17  ;;  %v167_v37 = vld [vmem:[%s501_s3 + $0x8] sm:$0xff]  ;;  %v166_v42 = vld [vmem:[%s501_s3] sm:$0xff] }
   0xd   :  { %218 = vmatpush.msra.mxu1 %v160_v18  ;;  %v21_v43 = vld [vmem:[%s502_s0 + $0x4] sm:$0xf]  ;;  %v20_v63 = vld [vmem:[%s502_s0] sm:$0xf] }
   0xe   :  { %193 = vmatpush.msra.mxu0 %v176_v19 }
   0xf   :  { %219 = vmatpush.msra.mxu1 %v159_v20 }
  0x10   :  { %194 = vmatpush.msra.mxu0 %v175_v21 }
  0x11   :  { %220 = vmatpush.msra.mxu1 %v158_v22 }
  0x12   :  { %195 = vmatpush.msra.mxu0 %v174_v23 }
  0x13   :  { %221 = vmatpush.msra.mxu1 %v157_v24 }
  0x14   :  { %28 = vperm.xlu1 %244, %v23_v7   ;;  %196 = vmatpush.msra.mxu0 %v173_v25 }
  0x15   :  { %222 = vmatpush.msra.mxu1 %v156_v26 }
  0x16   :  { %197 = vmatpush.msra.mxu0 %v172_v27 }
  0x17   :  { %223 = vmatpush.msra.mxu1 %v155_v28 }
  0x18   :  { %198 = vmatpush.msra.mxu0 %v171_v29 }
  0x19   :  { %224 = vmatpush.msra.mxu1 %v154_v30 }
  0x1a   :  { %199 = vmatpush.msra.mxu0 %v170_v31 }
  0x1b   :  { %225 = vmatpush.msra.mxu1 %v153_v32 }
  0x1c   :  { %200 = vmatpush.msra.mxu0 %v169_v33 }
  0x1d   :  { %226 = vmatpush.msra.mxu1 %v152_v34 }
  0x1e   :  { %201 = vmatpush.msra.mxu0 %v168_v35 }
  0x1f   :  { %227 = vmatpush.msra.mxu1 %v151_v36 }
  0x20   :  { %202 = vmatpush.msra.mxu0 %v167_v37 }
  0x21   :  { %228 = vmatpush.msra.mxu1 %v150_v38 }
  0x22   :  { %203 = vmatpush.msra.mxu0 %v166_v42 }
  0x76   :  { %v75_v39 = vpop.xlane.xlu0 %74 }
  0x77   :  { %v381_v40 = vmax.f32 %v75_v39, 1.0 }
  0x79   :  { %v384_v41 = vrot.slane %v381_v40, 1  ;;  %247 = vrcp.f32 %v381_v40  ;;  %v97_v59 = vand.u32 2147483648, %v381_v40  ;;  %v95_v4 = vand.u32 2147483647, %v381_v40 }
  0x7a   :  { %vm91_vm3 = vweird.f32 %v381_v40 }
  0x7b   :  { %249 = vrcp.f32 %v384_v41  ;;  %v110_v60 = vand.u32 2147483647, %v384_v41  ;;  %vm106_vm2 = vweird.f32 %v384_v41  ;;  %v112_v9 = vand.u32 2147483648, %v384_v41 }
  0x7c   :  { %v98_v12 = vor.u32 1.1754944e-38, %v97_v59  ;;  %vm435_vm7 = vcmp.eq.f32.partialorder %v95_v4, 8.507059e+37 }
  0x7d   :  { %vm424_vm4 = vcmp.eq.f32.partialorder %v110_v60, 8.507059e+37  ;;  %v113_v23 = vor.u32 1.1754944e-38, %v112_v9 }
  0x7e   :  { %v80_v44 = vpop.xlane.xlu0 %79  ;;  %v36_v45 = vpop.permute.xlu1 %35 }
  0x7f   :  { %v394_v46 = vpop.eup %247  ;;  %v396_v47 = vmax.f32 %v80_v44, 1.0  ;;  %v38_v48 = vmul.f32 %v36_v45, %v21_v43  ;;  %v55_v49 = vsub.f32 1.0, %v36_v45 }
  0x80   :  { %v87_v50 = vmul.f32 %v394_v46, %v381_v40  ;;  %vm92_vm6 = vweird.f32 %v394_v46 }
  0x81   :  { %v400_v51 = vpop.eup %249  ;;  %v403_v52 = vrot.slane %v396_v47, 1  ;;  %251 = vrcp.f32 %v396_v47  ;;  %v47_v53 = vsel %vm39_vm1, %v38_v48, 0.0  ;;  %v57_v54 = vmul.f32 %v55_v49, %v21_v43  ;;  %vm462_vm12 = vmor %vm91_vm3, %vm92_vm6 }
  0x82   :  { %v48_v55 = vrot.slane %v47_v53, 4  ;;  %v102_v56 = vmul.f32 %v400_v51, %v384_v41  ;;  %v88_v58 = vsub.f32 1.0, %v87_v50  ;;  %vm107_vm5 = vweird.f32 %v400_v51 }
  0x83   :  { %v65_v57 = vsel %vm39_vm1, %v57_v54, 0.0  ;;  %253 = vrcp.f32 %v403_v52  ;;  %vm125_vm8 = vweird.f32 %v396_v47  ;;  %v129_v28 = vand.u32 2147483647, %v396_v47  ;;  %vm444_vm9 = vmor %vm106_vm2, %vm107_vm5 }
  0x84   :  { %v49_v61 = vadd.f32 %v48_v55, %v47_v53  ;;  %v66_v62 = vrot.slane %v65_v57, 4  ;;  %v103_v0 = vsub.f32 1.0, %v102_v56  ;;  %v89_v11 = vmul.f32 %v394_v46, %v88_v58 }
  0x85   :  { %v131_v38 = vand.u32 2147483648, %v396_v47  ;;  %v144_v41 = vand.u32 2147483647, %v403_v52  ;;  %v146_v45 = vand.u32 2147483648, %v403_v52  ;;  %vm479_vm15 = vcmp.eq.f32.partialorder %v129_v28, 8.507059e+37 }
  0x86   :  { %v50_v1 = vrot.slane %v49_v61, 2  ;;  %v67_v2 = vadd.f32 %v66_v62, %v65_v57  ;;  %v29_v3 = vpop.permute.xlu1 %28  ;;  %v104_v5 = vmul.f32 %v400_v51, %v103_v0  ;;  %v90_v30 = vadd.f32 %v394_v46, %v89_v11 }
  0x87   :  { %v418_v6 = vpop.eup %251  ;;  %v37_v7 = vmul.f32 %v29_v3, %v20_v63  ;;  %v54_v8 = vsub.f32 1.0, %v29_v3  ;;  %v132_v58 = vor.u32 1.1754944e-38, %v131_v38  ;;  %vm140_vm0 = vweird.f32 %v403_v52 }
  0x88   :  { %v51_v10 = vadd.f32 %v50_v1, %v49_v61  ;;  %v68_v14 = vrot.slane %v67_v2, 2  ;;  %v121_v17 = vmul.f32 %v418_v6, %v396_v47  ;;  %v105_v21 = vadd.f32 %v400_v51, %v104_v5 }
  0x89   :  { %v40_v15 = vsel %vm39_vm1, %v37_v7, 0.0  ;;  %v56_v16 = vmul.f32 %v54_v8, %v20_v63  ;;  %v254_v18 = vpop.eup %253  ;;  %vm126_vm11 = vweird.f32 %v418_v6  ;;  %v94_v55 = vsel %vm462_vm12, %v394_v46, %v90_v30 }
  0x8a   :  { %v52_v19 = vrot.slane %v51_v10, 1  ;;  %v41_v20 = vrot.slane %v40_v15, 4  ;;  %v122_v24 = vsub.f32 1.0, %v121_v17  ;;  %v69_v29 = vadd.f32 %v68_v14, %v67_v2  ;;  %vm475_vm14 = vmor %vm125_vm8, %vm126_vm11 }
  0x8b   :  { %v58_v22 = vsel %vm39_vm1, %v56_v16, 0.0  ;;  %v136_v33 = vmul.f32 %v254_v18, %v403_v52  ;;  %v109_v37 = vsel %vm444_vm9, %v400_v51, %v105_v21  ;;  %vm141_vm13 = vweird.f32 %v254_v18 }
  0x8c   :  { %v42_v25 = vadd.f32 %v41_v20, %v40_v15  ;;  %v59_v26 = vrot.slane %v58_v22, 4  ;;  %v123_v32 = vmul.f32 %v418_v6, %v122_v24  ;;  %v53_v36 = vadd.f32 %v52_v19, %v51_v10  ;;  %vm142_vm1 = vmor %vm140_vm0, %vm141_vm13  ;;  %v246_v10 = vld [vmem:[%s503_s4] ss:$0 sm:$0xff] }
  0x8d   :  { %v137_v39 = vsub.f32 1.0, %v136_v33  ;;  %v114_v49 = vsel %vm424_vm4, %v113_v23, %v109_v37  ;;  %v70_v50 = vrot.slane %v69_v29, 1  ;;  %v147_v47 = vor.u32 1.1754944e-38, %v146_v45 }
  0x8e   :  { %v43_v34 = vrot.slane %v42_v25, 2  ;;  %v60_v35 = vadd.f32 %v59_v26, %v58_v22  ;;  %v124_v44 = vadd.f32 %v418_v6, %v123_v32  ;;  %v115_v56 = vmul.f32 %v114_v49, %v53_v36 }
  0x8f   :  { %v138_v51 = vmul.f32 %v254_v18, %v137_v39  ;;  %v99_v62 = vsel %vm435_vm7, %v98_v12, %v94_v55  ;;  %v71_v63 = vadd.f32 %v70_v50, %v69_v29  ;;  %vm145_vm2 = vcmp.eq.f32.partialorder %v144_v41, 8.507059e+37 }
  0x90   :  { %v44_v42 = vadd.f32 %v43_v34, %v42_v25  ;;  %v61_v43 = vrot.slane %v60_v35, 2  ;;  %v128_v46 = vsel %vm475_vm14, %v418_v6, %v124_v44  ;;  %v210_v2 = vrot.slane %v115_v56, 7 }
  0x91   :  { %v139_v59 = vadd.f32 %v254_v18, %v138_v51  ;;  %v133_v52 = vsel %vm479_vm15, %v132_v58, %v128_v46  ;;  %vm238_vm3 = vcmask 517120  }
  0x92   :  { %v45_v53 = vrot.slane %v44_v42, 1  ;;  %v62_v54 = vadd.f32 %v61_v43, %v60_v35 }
  0x93   :  { %v143_v0 = vsel %vm142_vm1, %v254_v18, %v139_v59 }
  0x94   :  { %v46_v60 = vadd.f32 %v45_v53, %v44_v42  ;;  %v63_v61 = vrot.slane %v62_v54, 1  ;;  %v148_v4 = vsel %vm145_vm2, %v147_v47, %v143_v0 }
  0x95   :  { %v149_v5 = vmul.f32 %v148_v4, %v71_v63 }
  0x96   :  { %v100_v1 = vmul.f32 %v99_v62, %v46_v60  ;;  %v64_v3 = vadd.f32 %v63_v61, %v62_v54 }
  0x97   :  { %v184_v6 = vrot.slane %v149_v5, 7 }
  0x98   :  { %v211_v7 = vsel %vm185_vm10, %v210_v2, %v100_v1  ;;  %v134_v8 = vmul.f32 %v133_v52, %v64_v3 }
  0x99   :  { %229 = vmatmul.f32.vlgmr.msra.gmra.mxu1 %v211_v7 }
  0x9a   :  { %v186_v9 = vsel %vm185_vm10, %v184_v6, %v134_v8 }
  0x9b   :  { %204 = vmatmul.f32.vlgmr.msra.gmra.mxu0 %v186_v9 }
 0x116   :  { %v230_v11 = vpop.f32.mrf.mxu1 }
 0x118   :  { %v205_v12 = vpop.f32.mrf.mxu0 }
 0x119   :  { %v231_v13 = vadd.f32 %v230_v11, %v205_v12 }
 0x11b   :  { %v237_v14 = vadd.f32 %v246_v10, %v231_v13 }
 0x11d   :  { %239 = vst.msk [vmem:[%s504_s5] sm:$0x3] %vm238_vm3, %v237_v14 }

// kernel: ecg_speaker_forward.7
= control target key start
LH: loop header
LB: loop body
LE: loop exit
PB: predicated region body
PF: predicated region fallthrough
CT: control target
= control target key end

     0   :  { %v52_v0 = vlaneseq  ;;  %vm65_vm0 = vcmask 130048   ;;  %v811_v10 = vmov 0.0   ;;  %vm60_vm2 = vcmask 123904   ;;  %s1242_s1 = inlined_call_operand.vmem [shape: f32[16,32], index: 1, kind: input, shape index: {}]   ;;  %s1243_s6 = inlined_call_operand.vmem [shape: f32[64,64], index: 6, kind: input, shape index: {}]   ;;  %s1244_s5 = inlined_call_operand.vmem [shape: f32[64,64], index: 5, kind: input, shape index: {}]   ;;  %s1245_s2 = inlined_call_operand.vmem [shape: f32[32,64], index: 2, kind: input, shape index: {}]   ;;  %s1246_s3 = inlined_call_operand.vmem [shape: f32[32,64], index: 3, kind: input, shape index: {}]   ;;  %s1247_s15 = inlined_call_operand.vmem [shape: f32[4,2,16], index: 15, kind: output, shape index: {0}]   ;;  %s1248_s0 = inlined_call_operand.vmem [shape: f32[2,64], index: 0, kind: input, shape index: {}]   ;;  %s1249_s9 = inlined_call_operand.vmem [shape: f32[1,64], index: 9, kind: input, shape index: {}]   ;;  %s1250_s4 = inlined_call_operand.vmem [shape: f32[32,64], index: 4, kind: input, shape index: {}]   ;;  %s1251_s7 = inlined_call_operand.vmem [shape: f32[64,64], index: 7, kind: input, shape index: {}]   ;;  %s1252_s8 = inlined_call_operand.vmem [shape: f32[1,64], index: 8, kind: input, shape index: {}]   ;;  %s1253_s10 = inlined_call_operand.vmem [shape: f32[1,64], index: 10, kind: input, shape index: {}]   ;;  %s1254_s11 = inlined_call_operand.vmem [shape: f32[1,64], index: 11, kind: input, shape index: {}]   ;;  %s1255_s13 = inlined_call_operand.vmem [shape: f32[1,16], index: 13, kind: input, shape index: {}]   ;;  %s1256_s12 = inlined_call_operand.vmem [shape: f32[64,16], index: 12, kind: input, shape index: {}]   ;;  %s1257_s14 = inlined_call_operand.vmem [shape: f32[2,2,16], index: 14, kind: input, shape index: {}]   ;;  %s1258_s16 = inlined_call_operand.vmem [shape: s32[2,1], index: 16, kind: output, shape index: {1}]  }
   0x1   :  { %1260 = sst [smem:[#allocation2_spill]] %s1242_s1  ;;  %v910_v3 = vld [vmem:[%s1243_s6 + $0x38] sm:$0xff]  ;;  %v919_v5 = vld [vmem:[%s1243_s6 + $0x30] sm:$0xff]  ;;  %v924_v6 = vld [vmem:[%s1243_s6 + $0x28] sm:$0xff]  ;;  %vm101_vm3 = vcmask 523264   ;;  %vm125_vm4 = vcmask 261120  }
   0x2   :  { %s1261_s23 = sld [smem:[#allocation2_spill]]  ;;  %v913_v4 = vand.u32 127, %v52_v0  ;;  %193 = vmatpush.msra.mxu3 %v910_v3  ;;  %v100_v7 = vld [vmem:[%s1244_s5 + $0x38] sm:$0xff]  ;;  %v99_v8 = vld [vmem:[%s1244_s5 + $0x30] sm:$0xff]  ;;  %v944_v12 = vld [vmem:[%s1243_s6 + $0x20] sm:$0xff] }
   0x3   :  { %v938_v9 = vld [vmem:[%s1245_s2 + $0x18] sm:$0xff]  ;;  %113 = vmatpush.msra.mxu1 %v100_v7  ;;  %v98_v14 = vld [vmem:[%s1244_s5 + $0x28] sm:$0xff]  ;;  %v964_v15 = vld [vmem:[%s1245_s2 + $0x10] sm:$0xff] }
   0x4   :  { %vm54_vm1 = vcmp.eq.s32.totalorder %v913_v4, 1  ;;  %194 = vmatpush.msra.mxu3 %v919_v5  ;;  %141 = vmatpush.msra.mxu2 %v938_v9  ;;  %v950_v13 = vld [vmem:[%s1246_s3 + $0x18] sm:$0xff]  ;;  %v969_v16 = vld [vmem:[%s1246_s3 + $0x10] sm:$0xff]  ;;  %v980_v18 = vld [vmem:[%s1245_s2 + $0x8] sm:$0xff]  ;;  %vm57_vm15 = vcmp.eq.s32.totalorder %v913_v4, 2 }
   0x5   :  { %v739_v11 = vsel %vm54_vm1, 1.0, %v811_v10  ;;  %v974_v17 = vld [vmem:[%s1243_s6 + $0x18] sm:$0xff]  ;;  %114 = vmatpush.msra.mxu1 %v99_v8  ;;  %v97_v19 = vld [vmem:[%s1244_s5 + $0x20] sm:$0xff]  ;;  %v990_v20 = vld [vmem:[%s1246_s3 + $0x8] sm:$0xff] }
   0x6   :  { %61 = vst.msk [vmem:[%s1247_s15] sm:$0x3] %vm60_vm2, %v739_v11  ;;  %195 = vmatpush.msra.mxu3 %v924_v6  ;;  %142 = vmatpush.msra.mxu2 %v964_v15  ;;  %v995_v21 = vld [vmem:[%s1243_s6 + $0x10] sm:$0xff]  ;;  %v1003_v22 = vld [vmem:[%s1243_s6 + $0x8] sm:$0xff]  ;;  %v1010_v23 = vld [vmem:[%s1243_s6] sm:$0xff] }
   0x7   :  { %115 = vmatpush.msra.mxu1 %v98_v14  ;;  %v1016_v24 = vld [vmem:[%s1248_s0] sm:$0x3]  ;;  %v96_v25 = vld [vmem:[%s1244_s5 + $0x18] sm:$0xff]  ;;  %v95_v28 = vld [vmem:[%s1244_s5 + $0x10] sm:$0xff] }
   0x8   :  { %v900_v1 = vld [vmem:[%s1261_s23 + $0x8] sm:$0xff]  ;;  %v905_v2 = vld [vmem:[%s1261_s23] sm:$0xff]  ;;  %196 = vmatpush.msra.mxu3 %v944_v12  ;;  %143 = vmatpush.msra.mxu2 %v980_v18  ;;  %v1042_v29 = vld [vmem:[%s1250_s4 + $0x18] sm:$0xff] }
   0x9   :  { %83 = vmatpush.msra.mxu0 %v900_v1  ;;  %116 = vmatpush.msra.mxu1 %v97_v19  ;;  %v1027_v26 = vld [vmem:[%s1245_s2] sm:$0xff]  ;;  %v94_v30 = vld [vmem:[%s1244_s5 + $0x8] sm:$0xff]  ;;  %v1051_v31 = vld [vmem:[%s1250_s4 + $0x10] sm:$0xff] }
   0xa   :  { %197 = vmatpush.msra.mxu3 %v974_v17  ;;  %v1032_v27 = vld [vmem:[%s1246_s3] sm:$0xff]  ;;  %144 = vmatpush.msra.mxu2 %v1027_v26  ;;  %v1059_v33 = vld [vmem:[%s1250_s4 + $0x8] sm:$0xff]  ;;  %v284_v35 = vld [vmem:[%s1251_s7 + $0x38] sm:$0xff] }
   0xb   :  { %84 = vmatpush.msra.mxu0 %v905_v2  ;;  %117 = vmatpush.msra.mxu1 %v96_v25  ;;  %v93_v32 = vld [vmem:[%s1244_s5] sm:$0xff]  ;;  %v283_v36 = vld [vmem:[%s1251_s7 + $0x30] sm:$0xff]  ;;  %v282_v37 = vld [vmem:[%s1251_s7 + $0x28] sm:$0xff] }
   0xc   :  { %741 = vmatmul.msk.f32.vlgmr.msra.gmra.mxu0 %vm65_vm0, %v739_v11  ;;  %198 = vmatpush.msra.mxu3 %v995_v21  ;;  %v1065_v34 = vld [vmem:[%s1250_s4] sm:$0xff]  ;;  %v280_v39 = vld [vmem:[%s1251_s7 + $0x18] sm:$0xff]  ;;  %v279_v40 = vld [vmem:[%s1251_s7 + $0x10] sm:$0xff] }
   0xd   :  { %217 = vmatpush.msrb.mxu0 %v950_v13  ;;  %118 = vmatpush.msra.mxu1 %v95_v28  ;;  %v281_v38 = vld [vmem:[%s1251_s7 + $0x20] sm:$0xff]  ;;  %v278_v41 = vld [vmem:[%s1251_s7 + $0x8] sm:$0xff]  ;;  %v323_v53 = vld [vmem:[%s1256_s12 + $0x38] sm:$0xff] }
   0xe   :  { %199 = vmatpush.msra.mxu3 %v1003_v22  ;;  %269 = vmatpush.msrb.mxu2 %v1042_v29  ;;  %v277_v42 = vld [vmem:[%s1251_s7] sm:$0xff]  ;;  %v322_v55 = vld [vmem:[%s1256_s12 + $0x30] sm:$0xff]  ;;  %v321_v57 = vld [vmem:[%s1256_s12 + $0x28] sm:$0xff] }
   0xf   :  { %218 = vmatpush.msrb.mxu0 %v969_v16  ;;  %119 = vmatpush.msra.mxu1 %v94_v30  ;;  %v773_v45 = vld [vmem:[%s1249_s9] ss:$0 sm:$0xff]  ;;  %v319_v62 = vld [vmem:[%s1256_s12 + $0x18] sm:$0xff]  ;;  %v318_v63 = vld [vmem:[%s1256_s12 + $0x10] sm:$0xff] }
  0x10   :  { %200 = vmatpush.msra.mxu3 %v1010_v23  ;;  %270 = vmatpush.msrb.mxu2 %v1051_v31  ;;  %v774_v51 = vld [vmem:[%s1252_s8] ss:$0 sm:$0xff]  ;;  %v317_v0 = vld [vmem:[%s1256_s12 + $0x8] sm:$0xff] }
  0x11   :  { %219 = vmatpush.msrb.mxu0 %v990_v20  ;;  %745 = vmatmul.msk.f32.vlgmr.msra.gmra.mxu3 %vm101_vm3, %v1016_v24  ;;  %v320_v59 = vld [vmem:[%s1256_s12 + $0x20] sm:$0xff] }
  0x12   :  { %439 = vmatpush.msrb.mxu3 %v100_v7  ;;  %120 = vmatpush.msra.mxu1 %v93_v32 }
  0x13   :  { %220 = vmatpush.msrb.mxu0 %v1032_v27  ;;  %271 = vmatpush.msrb.mxu2 %v1059_v33 }
  0x14   :  { %440 = vmatpush.msrb.mxu3 %v99_v8  ;;  %742 = vmatmul.msk.f32.vlgmr.msra.gmra.mxu1 %vm101_vm3, %v1016_v24 }
  0x15   :  { %272 = vmatpush.msrb.mxu2 %v1065_v34  ;;  %297 = vmatpush.msra.mxu0 %v284_v35 }
  0x16   :  { %441 = vmatpush.msrb.mxu3 %v98_v14  ;;  %339 = vmatpush.msrb.mxu1 %v323_v53 }
  0x17   :  { %298 = vmatpush.msra.mxu0 %v283_v36 }
  0x18   :  { %442 = vmatpush.msrb.mxu3 %v97_v19  ;;  %340 = vmatpush.msrb.mxu1 %v322_v55 }
  0x19   :  { %299 = vmatpush.msra.mxu0 %v282_v37 }
  0x1a   :  { %443 = vmatpush.msrb.mxu3 %v96_v25  ;;  %341 = vmatpush.msrb.mxu1 %v321_v57 }
  0x1b   :  { %300 = vmatpush.msra.mxu0 %v281_v38 }
  0x1c   :  { %444 = vmatpush.msrb.mxu3 %v95_v28  ;;  %342 = vmatpush.msrb.mxu1 %v320_v59 }
  0x1d   :  { %301 = vmatpush.msra.mxu0 %v280_v39 }
  0x1e   :  { %445 = vmatpush.msrb.mxu3 %v94_v30  ;;  %343 = vmatpush.msrb.mxu1 %v319_v62 }
  0x1f   :  { %302 = vmatpush.msra.mxu0 %v279_v40 }
  0x20   :  { %446 = vmatpush.msrb.mxu3 %v93_v32  ;;  %344 = vmatpush.msrb.mxu1 %v318_v63 }
  0x21   :  { %303 = vmatpush.msra.mxu0 %v278_v41 }
  0x22   :  { %622 = vmatpush.msra.mxu3 %v284_v35  ;;  %345 = vmatpush.msrb.mxu1 %v317_v0 }
  0x23   :  { %304 = vmatpush.msra.mxu0 %v277_v42 }
  0x24   :  { %623 = vmatpush.msra.mxu3 %v283_v36 }
  0x26   :  { %624 = vmatpush.msra.mxu3 %v282_v37 }
  0x28   :  { %625 = vmatpush.msra.mxu3 %v281_v38 }
  0x2a   :  { %626 = vmatpush.msra.mxu3 %v280_v39 }
  0x2c   :  { %627 = vmatpush.msra.mxu3 %v279_v40 }
  0x2e   :  { %628 = vmatpush.msra.mxu3 %v278_v41 }
  0x30   :  { %629 = vmatpush.msra.mxu3 %v277_v42 }
  0x89   :  { %v86_v43 = vpop.f32.mrf.mxu0 }
  0x8a   :  { %743 = vmatmul.msk.f32.vlgmr.msra.gmra.mxu2 %vm125_vm4, %v86_v43  ;;  %746 = vmatmul.msk.f32.vlgmr.msrb.gmra.mxu0 %vm125_vm4, %v86_v43 }
  0x8b   :  { %518 = vmatpush.msrb.mxu0 %v910_v3  ;;  %413 = vmatpush.msra.mxu2 %v900_v1  ;;  %v316_v1 = vld [vmem:[%s1256_s12] sm:$0xff] }
  0x8c   :  { %346 = vmatpush.msrb.mxu1 %v316_v1 }
  0x8d   :  { %519 = vmatpush.msrb.mxu0 %v919_v5  ;;  %414 = vmatpush.msra.mxu2 %v905_v2 }
  0x8e   :  { %664 = vmatpush.msra.mxu1 %v323_v53 }
  0x8f   :  { %520 = vmatpush.msrb.mxu0 %v924_v6 }
  0x90   :  { %665 = vmatpush.msra.mxu1 %v322_v55 }
  0x91   :  { %521 = vmatpush.msrb.mxu0 %v944_v12  ;;  %v122_v49 = vpop.f32.mrf.mxu1  ;;  %v776_v12 = vld [vmem:[%s1254_s11] ss:$0 sm:$0xff] }
  0x92   :  { %748 = vmatmul.msk.f32.vlgmr.msrb.gmra.mxu2 %vm125_vm4, %v86_v43  ;;  %749 = vmatmul.msk.f32.vlgmr.msra.gmra.mxu0 %vm101_vm3, %v1016_v24 }
  0x93   :  { %522 = vmatpush.msrb.mxu0 %v974_v17  ;;  %466 = vmatpush.msrb.mxu2 %v938_v9 }
  0x94   :  { %v202_v44 = vpop.f32.mrf.mxu3  ;;  %666 = vmatpush.msra.mxu1 %v321_v57 }
  0x95   :  { %523 = vmatpush.msrb.mxu0 %v995_v21  ;;  %467 = vmatpush.msrb.mxu2 %v964_v15  ;;  %v775_v21 = vld [vmem:[%s1253_s10] ss:$0 sm:$0xff] }
  0x96   :  { %667 = vmatpush.msra.mxu1 %v320_v59 }
  0x97   :  { %524 = vmatpush.msrb.mxu0 %v1003_v22  ;;  %468 = vmatpush.msrb.mxu2 %v980_v18 }
  0x98   :  { %668 = vmatpush.msra.mxu1 %v319_v62 }
  0x99   :  { %525 = vmatpush.msrb.mxu0 %v1010_v23  ;;  %469 = vmatpush.msrb.mxu2 %v1027_v26 }
  0x9a   :  { %669 = vmatpush.msra.mxu1 %v318_v63 }
  0x9c   :  { %670 = vmatpush.msra.mxu1 %v317_v0 }
  0x9e   :  { %671 = vmatpush.msra.mxu1 %v316_v1 }
 0x107   :  { %v222_v46 = vpop.f32.mrf.mxu0 }
 0x108   :  { %v223_v47 = vadd.f32 %v222_v46, %v202_v44 }
 0x10a   :  { %v229_v48 = vadd.f32 %v773_v45, %v223_v47 }
 0x10c   :  { %v747_v50 = vmul.f32 -1.442695, %v229_v48  ;;  %v777_v48 = vld [vmem:[%s1255_s13] ss:$0 sm:$0xff] }
 0x10d   :  { %v146_v52 = vpop.f32.mrf.mxu2 }
 0x10e   :  { %783 = vpow2.f32 %v747_v50  ;;  %v147_v54 = vadd.f32 %v146_v52, %v122_v49 }
 0x10f   :  { %v306_v15 = vpop.f32.mrf.mxu0 }
 0x110   :  { %v153_v56 = vadd.f32 %v774_v51, %v147_v54  ;;  %v307_v23 = vadd.f32 %v776_v12, %v306_v15 }
 0x112   :  { %v744_v58 = vmul.f32 -1.442695, %v153_v56 }
 0x114   :  { %v784_v60 = vpop.eup %783  ;;  %785 = vpow2.f32 %v744_v58 }
 0x115   :  { %v233_v61 = vadd.f32 1.0, %v784_v60  ;;  %v274_v25 = vpop.f32.mrf.mxu2  ;;  %v364_v60 = vld [vmem:[%s1257_s14] sm:$0x3] }
 0x116   :  { %v275_v36 = vadd.f32 %v775_v21, %v274_v25 }
 0x117   :  { %787 = vrcp.f32 %v233_v61  ;;  %v245_v35 = vand.u32 2147483648, %v233_v61  ;;  %vm239_vm10 = vweird.f32 %v233_v61  ;;  %v243_v38 = vand.u32 2147483647, %v233_v61 }
 0x119   :  { %v246_v41 = vor.u32 1.1754944e-38, %v245_v35  ;;  %vm244_vm12 = vcmp.eq.f32.partialorder %v243_v38, 8.507059e+37 }
 0x11a   :  { %v786_v2 = vpop.eup %785 }
 0x11b   :  { %v157_v3 = vadd.f32 1.0, %v786_v2 }
 0x11d   :  { %789 = vrcp.f32 %v157_v3  ;;  %v788_v5 = vpop.eup %787  ;;  %v169_v14 = vand.u32 2147483648, %v157_v3  ;;  %v167_v18 = vand.u32 2147483647, %v157_v3  ;;  %vm163_vm6 = vweird.f32 %v157_v3 }
 0x11e   :  { %v235_v6 = vmul.f32 %v788_v5, %v233_v61  ;;  %vm240_vm9 = vweird.f32 %v788_v5 }
 0x11f   :  { %v170_v26 = vor.u32 1.1754944e-38, %v169_v14  ;;  %vm168_vm8 = vcmp.eq.f32.partialorder %v167_v18, 8.507059e+37  ;;  %vm241_vm11 = vmor %vm239_vm10, %vm240_vm9 }
 0x120   :  { %v236_v9 = vsub.f32 1.0, %v235_v6 }
 0x122   :  { %v237_v19 = vmul.f32 %v788_v5, %v236_v9 }
 0x123   :  { %v790_v7 = vpop.eup %789 }
 0x124   :  { %v159_v8 = vmul.f32 %v790_v7, %v157_v3  ;;  %vm164_vm5 = vweird.f32 %v790_v7  ;;  %v238_v32 = vadd.f32 %v788_v5, %v237_v19 }
 0x125   :  { %vm165_vm7 = vmor %vm163_vm6, %vm164_vm5 }
 0x126   :  { %v160_v11 = vsub.f32 1.0, %v159_v8  ;;  %v242_v40 = vsel %vm241_vm11, %v788_v5, %v238_v32 }
 0x127   :  { %v247_v42 = vsel %vm244_vm12, %v246_v41, %v242_v40  ;;  %v778_v40 = vld [vmem:[%s1254_s11] ss:$0 sm:$0xff] }
 0x128   :  { %v161_v17 = vmul.f32 %v790_v7, %v160_v11  ;;  %v312_v43 = vsub.f32 1.0, %v247_v42  ;;  %v314_v46 = vmul.f32 %v247_v42, %v1016_v24  ;;  %v1174_v11 = vsel %vm57_vm15, 1.0, %v811_v10 }
 0x129   :  { %766 = vst.msk [vmem:[%s1247_s15 + $0x6] sm:$0x3] %vm60_vm2, %v1174_v11 }
 0x12a   :  { %v162_v22 = vadd.f32 %v790_v7, %v161_v17 }
 0x12c   :  { %v166_v28 = vsel %vm165_vm7, %v790_v7, %v162_v22 }
 0x12d   :  { %v171_v30 = vsel %vm168_vm8, %v170_v26, %v166_v28 }
 0x12e   :  { %v309_v37 = vmul.f32 %v307_v23, %v171_v30 }
 0x130   :  { %v310_v39 = vadd.f32 %v309_v37, %v275_v36 }
 0x132   :  { %791 = vtanh.f32 %v310_v39 }
 0x138   :  { %v792_v44 = vpop.eup %791 }
 0x139   :  { %v313_v45 = vmul.f32 %v792_v44, %v312_v43 }
 0x13b   :  { %v1151_v47 = vadd.f32 %v314_v46, %v313_v45  ;;  %v781_v45 = vld [vmem:[%s1253_s10] ss:$0 sm:$0xff] }
 0x13d   :  { %750 = vmatmul.msk.f32.vlgmr.msrb.gmra.mxu1 %vm101_vm3, %v1151_v47  ;;  %754 = vmatmul.msk.f32.vlgmr.msrb.gmra.mxu3 %vm101_vm3, %v1151_v47 }
 0x13e   :  { %757 = vmatmul.msk.f32.vlgmr.msrb.gmra.mxu0 %vm101_vm3, %v1151_v47 }
 0x145   :  { %761 = vmatmul.msk.f32.vlgmr.msra.gmra.mxu3 %vm101_vm3, %v1151_v47 }
 0x1ba   :  { %v348_v49 = vpop.f32.mrf.mxu1 }
 0x1bb   :  { %v349_v24 = vadd.f32 %v777_v48, %v348_v49 }
 0x1bd   :  { %v351_v50 = vsel %vm60_vm2, %v349_v24, -inf }
 0x1be   :  { %352 = vmax.xlane.f32.xlu0 %v351_v50 }
 0x231   :  { %v353_v51 = vpop.xlane.xlu0 %352 }
 0x232   :  { %v354_v52 = vsub.f32 %v349_v24, %v353_v51 }
 0x234   :  { %v355_v53 = vmul.f32 1.442695, %v354_v52 }
 0x236   :  { %793 = vpow2.f32 %v355_v53 }
 0x23c   :  { %v794_v54 = vpop.eup %793 }
 0x23d   :  { %v357_v55 = vsel %vm60_vm2, %v794_v54, 0.0 }
 0x23e   :  { %358 = vadd.xlane.f32.xlu0 %v357_v55 }
 0x2b1   :  { %v359_v56 = vpop.xlane.xlu0 %358 }
 0x2b2   :  { %795 = vlog2.f32 %v359_v56 }
 0x2b8   :  { %v796_v57 = vpop.eup %795 }
 0x2b9   :  { %v361_v58 = vmul.f32 0.6931472, %v796_v57 }
 0x2bb   :  { %v362_v59 = vadd.f32 %v361_v58, %v353_v51 }
 0x2bd   :  { %v363_v61 = vsub.f32 %v349_v24, %v362_v59 }
 0x2bf   :  { %v365_v62 = vadd.f32 %v364_v60, %v363_v61 }
 0x2c1   :  { %v366_v63 = vsel %vm60_vm2, %v365_v62, -inf }
 0x2c2   :  { %367 = vmax.xlane.f32.xlu1 %v366_v63 }
 0x335   :  { %v368_v0 = vpop.xlane.xlu1 %367 }
 0x336   :  { %vm369_vm13 = vcmp.eq.f32.partialorder %v365_v62, %v368_v0 }
 0x337   :  { %v370_v1 = vsel %vm369_vm13, %v913_v4, 16 }
 0x338   :  { %v371_v2 = vsel %vm60_vm2, %v370_v1, 2147483647 }
 0x339   :  { %v373_v3 = vshra.s32 %v371_v2, 16  ;;  %v372_v6 = vand.u32 65535, %v371_v2 }
 0x33b   :  { %v375_v5 = vcvt.s32.f32 %v373_v3  ;;  %v374_v8 = vcvt.s32.f32 %v372_v6  ;;  %v782_v6 = vld [vmem:[%s1255_s13] ss:$0 sm:$0xff] }
 0x33d   :  { %376 = vmin.xlane.f32.xlu1 %v375_v5 }
 0x3b0   :  { %v377_v7 = vpop.xlane.xlu1 %376 }
 0x3b1   :  { %vm378_vm14 = vcmp.eq.f32.partialorder %v375_v5, %v377_v7  ;;  %v383_v12 = vcvt.f32.s32 %v377_v7 }
 0x3b2   :  { %v379_v9 = vsel %vm378_vm14, %v374_v8, inf  ;;  %vm729_vm14 = vcmask 1024  }
 0x3b3   :  { %380 = vmin.xlane.f32.xlu2 %v379_v9  ;;  %v384_v15 = vshll.u32 %v383_v12, 16 }
 0x426   :  { %v381_v14 = vpop.xlane.xlu2 %380 }
 0x427   :  { %v382_v17 = vcvt.f32.s32 %v381_v14 }
 0x429   :  { %v385_v18 = vadd.s32 %v384_v15, %v382_v17 }
 0x42b   :  { %vm386_vm1 = vcmp.eq.s32.totalorder %v913_v4, %v385_v18 }
 0x42c   :  { %v1183_v19 = vsel %vm386_vm1, 1.0, %v811_v10 }
 0x42d   :  { %752 = vst.msk [vmem:[%s1247_s15 + $0x2] sm:$0x3] %vm60_vm2, %v1183_v19  ;;  %753 = vmatmul.msk.f32.vlgmr.msra.gmra.mxu2 %vm65_vm0, %v1183_v19 }
 0x42e   :  { %542 = vmatpush.msra.mxu2 %v950_v13  ;;  %v779_v13 = vld [vmem:[%s1252_s8] ss:$0 sm:$0xff] }
 0x430   :  { %543 = vmatpush.msra.mxu2 %v969_v16  ;;  %v448_v16 = vpop.f32.mrf.mxu3 }
 0x432   :  { %544 = vmatpush.msra.mxu2 %v990_v20 }
 0x434   :  { %545 = vmatpush.msra.mxu2 %v1032_v27 }
 0x438   :  { %v631_v43 = vpop.f32.mrf.mxu3 }
 0x439   :  { %v632_v24 = vadd.f32 %v778_v40, %v631_v43 }
 0x4b0   :  { %v416_v21 = vpop.f32.mrf.mxu2 }
 0x4b1   :  { %755 = vmatmul.msk.f32.vlgmr.msrb.gmra.mxu2 %vm125_vm4, %v416_v21 }
 0x4b2   :  { %594 = vmatpush.msrb.mxu2 %v1042_v29  ;;  %v780_v29 = vld [vmem:[%s1249_s9] ss:$0 sm:$0xff] }
 0x4b4   :  { %595 = vmatpush.msrb.mxu2 %v1051_v31  ;;  %v527_v31 = vpop.f32.mrf.mxu0 }
 0x4b6   :  { %596 = vmatpush.msrb.mxu2 %v1059_v33 }
 0x4b8   :  { %597 = vmatpush.msrb.mxu2 %v1065_v34 }
 0x4b9   :  { %758 = vmatmul.msk.f32.vlgmr.msra.gmra.mxu2 %vm125_vm4, %v416_v21 }
 0x4c1   :  { %760 = vmatmul.msk.f32.vlgmr.msrb.gmra.mxu2 %vm125_vm4, %v416_v21 }
 0x534   :  { %v471_v20 = vpop.f32.mrf.mxu2 }
 0x535   :  { %v472_v27 = vadd.f32 %v471_v20, %v448_v16  ;;  %v763_v20 = vld [vmem:[%s1257_s14 + $0x2] sm:$0x3] }
 0x537   :  { %v478_v22 = vadd.f32 %v779_v13, %v472_v27 }
 0x539   :  { %v756_v23 = vmul.f32 -1.442695, %v478_v22 }
 0x53b   :  { %797 = vpow2.f32 %v756_v23 }
 0x53c   :  { %v547_v33 = vpop.f32.mrf.mxu2 }
 0x53d   :  { %v548_v34 = vadd.f32 %v547_v33, %v527_v31 }
 0x53f   :  { %v554_v25 = vadd.f32 %v780_v29, %v548_v34  ;;  %v391_v29 = vmul.f32 %v1183_v19, %v1174_v11 }
 0x541   :  { %v798_v26 = vpop.eup %797  ;;  %v759_v28 = vmul.f32 -1.442695, %v554_v25  ;;  %v392_v31 = vsel %vm60_vm2, %v391_v29, 0.0 }
 0x542   :  { %v482_v30 = vadd.f32 1.0, %v798_v26 }
 0x543   :  { %799 = vpow2.f32 %v759_v28 }
 0x544   :  { %801 = vrcp.f32 %v482_v30  ;;  %v494_v39 = vand.u32 2147483648, %v482_v30  ;;  %v492_v42 = vand.u32 2147483647, %v482_v30  ;;  %vm488_vm4 = vweird.f32 %v482_v30  ;;  %v599_v49 = vpop.f32.mrf.mxu2 }
 0x545   :  { %v600_v54 = vadd.f32 %v781_v45, %v599_v49 }
 0x546   :  { %v495_v48 = vor.u32 1.1754944e-38, %v494_v39  ;;  %vm493_vm6 = vcmp.eq.f32.partialorder %v492_v42, 8.507059e+37 }
 0x549   :  { %v800_v32 = vpop.eup %799 }
 0x54a   :  { %v802_v35 = vpop.eup %801  ;;  %v558_v36 = vadd.f32 1.0, %v800_v32 }
 0x54b   :  { %v484_v37 = vmul.f32 %v802_v35, %v482_v30  ;;  %vm489_vm0 = vweird.f32 %v802_v35 }
 0x54c   :  { %803 = vrcp.f32 %v558_v36  ;;  %vm490_vm5 = vmor %vm488_vm4, %vm489_vm0  ;;  %v570_v56 = vand.u32 2147483648, %v558_v36  ;;  %v568_v58 = vand.u32 2147483647, %v558_v36  ;;  %vm564_vm8 = vweird.f32 %v558_v36 }
 0x54d   :  { %v485_v38 = vsub.f32 1.0, %v484_v37 }
 0x54e   :  { %v571_v61 = vor.u32 1.1754944e-38, %v570_v56  ;;  %vm569_vm10 = vcmp.eq.f32.partialorder %v568_v58, 8.507059e+37 }
 0x54f   :  { %v486_v41 = vmul.f32 %v802_v35, %v485_v38 }
 0x551   :  { %v487_v44 = vadd.f32 %v802_v35, %v486_v41 }
 0x552   :  { %v804_v46 = vpop.eup %803 }
 0x553   :  { %v560_v50 = vmul.f32 %v804_v46, %v558_v36  ;;  %v491_v51 = vsel %vm490_vm5, %v802_v35, %v487_v44  ;;  %vm565_vm7 = vweird.f32 %v804_v46 }
 0x554   :  { %v496_v52 = vsel %vm493_vm6, %v495_v48, %v491_v51  ;;  %vm566_vm9 = vmor %vm564_vm8, %vm565_vm7 }
 0x555   :  { %v561_v53 = vsub.f32 1.0, %v560_v50  ;;  %v634_v55 = vmul.f32 %v632_v24, %v496_v52 }
 0x557   :  { %v562_v57 = vmul.f32 %v804_v46, %v561_v53  ;;  %v635_v59 = vadd.f32 %v634_v55, %v600_v54 }
 0x559   :  { %v563_v60 = vadd.f32 %v804_v46, %v562_v57  ;;  %805 = vtanh.f32 %v635_v59 }
 0x55b   :  { %v567_v62 = vsel %vm566_vm9, %v804_v46, %v563_v60 }
 0x55c   :  { %v572_v63 = vsel %vm569_vm10, %v571_v61, %v567_v62 }
 0x55d   :  { %v637_v0 = vsub.f32 1.0, %v572_v63  ;;  %v639_v3 = vmul.f32 %v572_v63, %v1151_v47 }
 0x55f   :  { %v806_v1 = vpop.eup %805 }
 0x560   :  { %v638_v2 = vmul.f32 %v806_v1, %v637_v0 }
 0x562   :  { %v640_v5 = vadd.f32 %v639_v3, %v638_v2 }
 0x564   :  { %762 = vmatmul.msk.f32.vlgmr.msra.gmra.mxu1 %vm101_vm3, %v640_v5 }
 0x5e1   :  { %v673_v7 = vpop.f32.mrf.mxu1 }
 0x5e2   :  { %v674_v8 = vadd.f32 %v782_v6, %v673_v7 }
 0x5e4   :  { %v676_v9 = vsel %vm60_vm2, %v674_v8, -inf }
 0x5e5   :  { %677 = vmax.xlane.f32.xlu2 %v676_v9 }
 0x658   :  { %v678_v12 = vpop.xlane.xlu2 %677 }
 0x659   :  { %v679_v14 = vsub.f32 %v674_v8, %v678_v12 }
 0x65b   :  { %v680_v15 = vmul.f32 1.442695, %v679_v14 }
 0x65d   :  { %807 = vpow2.f32 %v680_v15 }
 0x663   :  { %v808_v17 = vpop.eup %807 }
 0x664   :  { %v682_v18 = vsel %vm60_vm2, %v808_v17, 0.0 }
 0x665   :  { %683 = vadd.xlane.f32.xlu0 %v682_v18 }
 0x6d8   :  { %v684_v47 = vpop.xlane.xlu0 %683 }
 0x6d9   :  { %809 = vlog2.f32 %v684_v47 }
 0x6df   :  { %v810_v21 = vpop.eup %809 }
 0x6e0   :  { %v686_v13 = vmul.f32 0.6931472, %v810_v21 }
 0x6e2   :  { %v687_v16 = vadd.f32 %v686_v13, %v678_v12 }
 0x6e4   :  { %v688_v27 = vsub.f32 %v674_v8, %v687_v16 }
 0x6e6   :  { %v691_v22 = vadd.f32 %v763_v20, %v688_v27 }
 0x6e8   :  { %v692_v23 = vsel %vm60_vm2, %v691_v22, -inf }
 0x6e9   :  { %693 = vmax.xlane.f32.xlu1 %v692_v23 }
 0x6f1   :  { %393 = vadd.xlane.f32.xlu1 %v392_v31 }
 0x75c   :  { %v694_v33 = vpop.xlane.xlu1 %693 }
 0x75d   :  { %vm695_vm3 = vcmp.eq.f32.partialorder %v691_v22, %v694_v33 }
 0x75e   :  { %v696_v34 = vsel %vm695_vm3, %v913_v4, 16 }
 0x75f   :  { %v697_v25 = vsel %vm60_vm2, %v696_v34, 2147483647 }
 0x760   :  { %v699_v26 = vshra.s32 %v697_v25, 16  ;;  %v698_v30 = vand.u32 65535, %v697_v25 }
 0x762   :  { %v701_v28 = vcvt.s32.f32 %v699_v26  ;;  %v700_v35 = vcvt.s32.f32 %v698_v30 }
 0x764   :  { %702 = vmin.xlane.f32.xlu2 %v701_v28  ;;  %v394_v44 = vpop.xlane.xlu1 %393 }
 0x765   :  { %v395_v45 = vmax.f32 %v394_v44, 0.0 }
 0x767   :  { %v721_v46 = vsub.f32 1.0, %v395_v45 }
 0x769   :  { %v722_v24 = vadd.f32 2.0, %v721_v46 }
 0x7d7   :  { %v703_v32 = vpop.xlane.xlu2 %702 }
 0x7d8   :  { %vm704_vm11 = vcmp.eq.f32.partialorder %v701_v28, %v703_v32  ;;  %v709_v37 = vcvt.f32.s32 %v703_v32 }
 0x7d9   :  { %v705_v36 = vsel %vm704_vm11, %v700_v35, inf }
 0x7da   :  { %706 = vmin.xlane.f32.xlu0 %v705_v36  ;;  %v710_v38 = vshll.u32 %v709_v37, 16 }
 0x84d   :  { %v707_v19 = vpop.xlane.xlu0 %706 }
 0x84e   :  { %v708_v39 = vcvt.f32.s32 %v707_v19 }
 0x850   :  { %v711_v40 = vadd.s32 %v710_v38, %v708_v39 }
 0x852   :  { %vm712_vm12 = vcmp.eq.s32.totalorder %v913_v4, %v711_v40 }
 0x853   :  { %v764_v41 = vsel %vm712_vm12, 1.0, %v811_v10 }
 0x854   :  { %v717_v42 = vmul.f32 %v764_v41, %v1174_v11  ;;  %765 = vst.msk [vmem:[%s1247_s15 + $0x4] sm:$0x3] %vm60_vm2, %v764_v41 }
 0x856   :  { %v718_v43 = vsel %vm60_vm2, %v717_v42, 0.0 }
 0x857   :  { %719 = vadd.xlane.f32.xlu2 %v718_v43 }
 0x8ca   :  { %v720_v48 = vpop.xlane.xlu2 %719 }
 0x8cb   :  { %v723_v49 = vmax.f32 %v395_v45, %v720_v48 }
 0x8cd   :  { %v726_v50 = vsub.f32 1.0, %v723_v49 }
 0x8cf   :  { %v727_v4 = vadd.f32 %v726_v50, %v722_v24 }
 0x8d1   :  { %vm767_vm13 = vcmp.lt.s32.totalorder %v727_v4, 0  ;;  %v768_v10 = vceil.f32 %v727_v4  ;;  %v769_v51 = vfloor.f32 %v727_v4 }
 0x8d3   :  { %v770_v11 = vsel %vm767_vm13, %v768_v10, %v769_v51 }
 0x8d4   :  { %v771_v52 = vcvt.f32.s32 %v770_v11 }
 0x8d6   :  { %730 = vst.msk [vmem:[%s1258_s16] sm:$0x3] %vm729_vm14, %v771_v52 }

</bundles_post_ra>
